<compile_context>
chip_gen: v6e
topology: v6e:2x2x1
jax: 0.10.0
libtpu: 0.0.40
codegen_flags: <defaults>
</compile_context>

<pallas_src>
import math
import functools

import jax
import jax.numpy as jnp
from jax import lax
from jax.experimental import pallas as pl
from jax.experimental.pallas import tpu as pltpu

# ---------------- model hyper-parameters (small, consistent with the module) -------------
B = 2            # number of prompts (batch)
L = 8            # sequence length (context length) -- power of two (mask uses shift/and)
D = 32           # transformer width
H = 4            # attention heads
DH = D // H      # head dim
DFF = 4 * D      # MLP hidden
NUM_LAYERS = 2   # transformer depth
N_CTX = 2        # MaPLe compound-prompt context tokens
E = 32           # text_projection output dim
EPS = 1e-5
BL = B * L

PADB = 8         # output rows padded to a full sublane tile
EPAD = 128       # output cols padded to a full lane tile (lane-dense unmasked store)

assert L & (L - 1) == 0, "L must be a power of two"
assert BL & (BL - 1) == 0, "B*L must be a power of two"
assert DH & (DH - 1) == 0, "head dim must be a power of two"
LOG2_L = L.bit_length() - 1
LOG2_BL = BL.bit_length() - 1
LOG2_DH = DH.bit_length() - 1


def _layer_norm(x, gain, bias):
    mu = jnp.mean(x, axis=-1, keepdims=True)
    var = jnp.mean(jnp.square(x - mu), axis=-1, keepdims=True)
    return (x - mu) * lax.rsqrt(var + EPS) * gain + bias


# ============================ fused text-encoder Pallas kernel ============================
def fused_text_encoder_kernel(x_ref,        # (BL, D)        prompt embeddings (flattened)
                              pos_ref,      # (BL, D)        positional embedding, pre-tiled
                              ctx_ref,      # (n_deep, BL, D) compound prompts, pre-placed
                              onehot_ref,   # (PADB, BL)     one-hot EOT selector
                              w_qkv_ref,    # (NL, D, 3D)    fused [wq|wk|wv]
                              b_qkv_ref,    # (NL, 1, 3D)
                              w_o_ref,      # (NL, D, D)
                              b_o_ref,      # (NL, 1, D)
                              w_fc_ref,     # (NL, D, DFF)
                              b_fc_ref,     # (NL, 1, DFF)
                              w_pr_ref,     # (NL, DFF, D)
                              b_pr_ref,     # (NL, 1, D)
                              ln_ref,       # (NL, 4, D)     rows: [g1, b1, g2, b2]
                              lnf_ref,      # (2, D)         [gamma; beta] of ln_final
                              tproj_ref,    # (D, EPAD)      text projection (zero-padded)
                              o_ref,        # (PADB, EPAD)   output (lane-dense)
                              *, n_deep):
    f32 = jnp.float32
    scale = 1.0 / math.sqrt(DH)

    # ---- constants, built ONCE (hoisted out of the layer loop) ----
    # block-diagonal (per-batch) causal bias for the head-stacked (H*BL, BL) score tile
    ri = lax.broadcasted_iota(jnp.int32, (H * BL, BL), 0)
    ci = lax.broadcasted_iota(jnp.int32, (H * BL, BL), 1)
    fi = jnp.bitwise_and(ri, BL - 1)                        # row index within one head block
    same_batch = jnp.right_shift(fi, LOG2_L) == jnp.right_shift(ci, LOG2_L)
    causal = jnp.bitwise_and(ci, L - 1) <= jnp.bitwise_and(fi, L - 1)
    bias_stack = jnp.where(same_batch & causal, 0.0, -1e9).astype(f32)     # (H*BL, BL)

    # per-head lane masks stacked along sublanes: row block h keeps lanes [h*DH,(h+1)*DH)
    row = lax.broadcasted_iota(jnp.int32, (H * BL, D), 0)
    lane = lax.broadcasted_iota(jnp.int32, (H * BL, D), 1)
    omask = (jnp.right_shift(lane, LOG2_DH) == jnp.right_shift(row, LOG2_BL)).astype(f32)
    qmask = omask * scale                                                  # scale folded in

    seq = jnp.bitwise_and(lax.broadcasted_iota(jnp.int32, (BL, 1), 0), L - 1)
    ctx_rows = (seq >= 1) & (seq < 1 + N_CTX)                              # (BL, 1)

    # ---- embeddings: prompts + positional (pos pre-tiled to (BL, D) by the wrapper) ----
    x = x_ref[...].astype(f32) + pos_ref[...].astype(f32)                  # (BL, D)

    # ---- transformer layers (unrolled; toy-size weights fully VMEM-resident) ----
    for layer in range(NUM_LAYERS):
        # MaPLe: from layer 1 on, replace the N_CTX prompt-context tokens.
        if layer >= 1 and (layer - 1) < n_deep:
            x = jnp.where(ctx_rows, ctx_ref[layer - 1].astype(f32), x)

        # leading-axis indexing only -> zero-cost views, lane offset always 0
        w_qkv = w_qkv_ref[layer].astype(f32)                               # (D, 3D)
        b_qkv = b_qkv_ref[layer].astype(f32)                               # (1, 3D)
        w_o = w_o_ref[layer].astype(f32)
        b_o = b_o_ref[layer].astype(f32)
        w_fc = w_fc_ref[layer].astype(f32)
        b_fc = b_fc_ref[layer].astype(f32)
        w_pr = w_pr_ref[layer].astype(f32)
        b_pr = b_pr_ref[layer].astype(f32)
        g1 = ln_ref[layer, 0:1, :].astype(f32)
        b1 = ln_ref[layer, 1:2, :].astype(f32)
        g2 = ln_ref[layer, 2:3, :].astype(f32)
        b2 = ln_ref[layer, 3:4, :].astype(f32)

        # ---- LN1 + fused-QKV multi-head causal self-attention ----
        xh = _layer_norm(x, g1, b1)
        qkv = jnp.dot(xh, w_qkv, preferred_element_type=f32) + b_qkv       # (BL, 3D), 1 push
        q = qkv[:, 0:D]
        k = qkv[:, D:2 * D]
        v = qkv[:, 2 * D:3 * D]

        # stack heads along sublanes -> one QK^T matmul and ONE softmax for all heads
        q_stack = jnp.concatenate([q] * H, axis=0) * qmask                 # (H*BL, D)
        s = lax.dot_general(q_stack, k, (((1,), (1,)), ((), ())),
                            preferred_element_type=f32) + bias_stack       # (H*BL, BL)
        s = s - jnp.max(s, axis=-1, keepdims=True)
        p = jnp.exp(s)
        p = p * pl.reciprocal(jnp.sum(p, axis=-1, keepdims=True), approx=True)

        # TODO(synk): at DH>=64 switch to per-head DH-wide contractions (2 heads / 128 lanes)
        #             to avoid the H-fold redundant MXU FLOPs of the lane-mask trick.
        o_stack = jnp.dot(p, v, preferred_element_type=f32) * omask        # (H*BL, D)
        attn = o_stack[0:BL]                        # disjoint lane masks => sum == concat
        for h in range(1, H):                       # static sublane-aligned slices
            attn = attn + o_stack[h * BL:(h + 1) * BL]
        x = x + jnp.dot(attn, w_o, preferred_element_type=f32) + b_o

        # ---- LN2 + MLP (QuickGELU, as in CLIP) ----
        xh = _layer_norm(x, g2, b2)
        hmid = jnp.dot(xh, w_fc, preferred_element_type=f32) + b_fc
        hmid = hmid * jax.nn.sigmoid(1.702 * hmid)
        x = x + jnp.dot(hmid, w_pr, preferred_element_type=f32) + b_pr

    # ---- vectorized EOT gather (one (PADB,BL) one-hot matmul) + ln_final + projection ----
    sel = jnp.dot(onehot_ref[...].astype(f32), x, preferred_element_type=f32)   # (PADB, D)
    sel = _layer_norm(sel, lnf_ref[0:1, :].astype(f32), lnf_ref[1:2, :].astype(f32))
    # single lane-dense (8, 128) unmasked store; wrapper slices to (B, E)
    o_ref[...] = jnp.dot(sel, tproj_ref[...].astype(f32),
                         preferred_element_type=f32).astype(o_ref.dtype)


def _full_vmem_spec(a):
    nd = a.ndim
    return pl.BlockSpec(a.shape, lambda: (0,) * nd)


# ================================ forward (wrapper + kernel) =============================
def text_encoder_forward(prompts, tokenized_prompts, compound_prompts_deeper_text, params):
    """
    prompts:                      (B, L, D) learned prompt embeddings
    tokenized_prompts:            (B, L)    token ids (argmax gives EOT position)
    compound_prompts_deeper_text: list of (N_CTX, D) arrays for layers >= 1
    returns:                      (B, E)    text features
    """
    n_deep = len(compound_prompts_deeper_text)
    x_flat = prompts.reshape(BL, D)                                    # free view
    pos_b = jnp.tile(params["pos_emb"], (B, 1))                        # (BL, D), tiled in XLA

    if n_deep > 0:
        ctx = jnp.stack(compound_prompts_deeper_text, axis=0)          # (n_deep, N_CTX, D)
        ctx_pad = jnp.zeros((n_deep, B, L, D), prompts.dtype)
        ctx_pad = ctx_pad.at[:, :, 1:1 + N_CTX, :].set(ctx[:, None])
        ctx_pad = ctx_pad.reshape(n_deep, BL, D)
    else:
        ctx_pad = jnp.zeros((1, BL, D), prompts.dtype)

    eot = jnp.argmax(tokenized_prompts, axis=-1).astype(jnp.int32)     # (B,)
    tgt = jnp.arange(B, dtype=jnp.int32) * L + eot                     # flat EOT row index
    onehot = jnp.zeros((PADB, BL), jnp.float32).at[jnp.arange(B), tgt].set(1.0)

    tproj_pad = jnp.zeros((D, EPAD), jnp.float32).at[:, :E].set(params["text_proj"])

    operands = (x_flat, pos_b, ctx_pad, onehot,
                params["w_qkv"], params["b_qkv"], params["w_o"], params["b_o"],
                params["w_fc"], params["b_fc"], params["w_pr"], params["b_pr"],
                params["ln"], params["lnf"], tproj_pad)

    out = pl.pallas_call(
        functools.partial(fused_text_encoder_kernel, n_deep=n_deep),
        out_shape=jax.ShapeDtypeStruct((PADB, EPAD), prompts.dtype),
        in_specs=[_full_vmem_spec(a) for a in operands],
        out_specs=pl.BlockSpec((PADB, EPAD), lambda: (0, 0)),
    )(*operands)
    return out[:B, :E]


# =============================== parameter construction ==================================
def init_params(key):
    ks = jax.random.split(key, 4 + NUM_LAYERS)
    pos_emb = 0.02 * jax.random.normal(ks[0], (L, D), jnp.float32)
    lnf = jnp.concatenate(
        [jnp.ones((1, D), jnp.float32) + 0.01 * jax.random.normal(ks[1], (1, D), jnp.float32),
         0.01 * jax.random.normal(ks[2], (1, D), jnp.float32)], axis=0)   # (2, D)
    text_proj = 0.02 * jax.random.normal(ks[3], (D, E), jnp.float32)

    w_qkv, b_qkv, w_o, b_o, w_fc, b_fc, w_pr, b_pr, ln = ([] for _ in range(9))
    for i in range(NUM_LAYERS):
        lk = jax.random.split(ks[4 + i], 14)
        wq = 0.02 * jax.random.normal(lk[0], (D, D), jnp.float32)
        wk = 0.02 * jax.random.normal(lk[1], (D, D), jnp.float32)
        wv = 0.02 * jax.random.normal(lk[2], (D, D), jnp.float32)
        w_qkv.append(jnp.concatenate([wq, wk, wv], axis=1))               # (D, 3D)
        b_qkv.append(0.01 * jax.random.normal(lk[3], (1, 3 * D), jnp.float32))
        w_o.append(0.02 * jax.random.normal(lk[4], (D, D), jnp.float32))
        b_o.append(0.01 * jax.random.normal(lk[5], (1, D), jnp.float32))
        w_fc.append(0.02 * jax.random.normal(lk[6], (D, DFF), jnp.float32))
        b_fc.append(0.01 * jax.random.normal(lk[7], (1, DFF), jnp.float32))
        w_pr.append(0.02 * jax.random.normal(lk[8], (DFF, D), jnp.float32))
        b_pr.append(0.01 * jax.random.normal(lk[9], (1, D), jnp.float32))
        ln.append(jnp.stack([
            jnp.ones((D,), jnp.float32) + 0.01 * jax.random.normal(lk[10], (D,), jnp.float32),
            0.01 * jax.random.normal(lk[11], (D,), jnp.float32),
            jnp.ones((D,), jnp.float32) + 0.01 * jax.random.normal(lk[12], (D,), jnp.float32),
            0.01 * jax.random.normal(lk[13], (D,), jnp.float32),
        ], axis=0))                                                        # (4, D)
    return {
        "pos_emb": pos_emb, "lnf": lnf, "text_proj": text_proj,
        "w_qkv": jnp.stack(w_qkv, 0), "b_qkv": jnp.stack(b_qkv, 0),
        "w_o": jnp.stack(w_o, 0), "b_o": jnp.stack(b_o, 0),
        "w_fc": jnp.stack(w_fc, 0), "b_fc": jnp.stack(b_fc, 0),
        "w_pr": jnp.stack(w_pr, 0), "b_pr": jnp.stack(b_pr, 0),
        "ln": jnp.stack(ln, 0),
    }


# ============================== pure-JAX reference (for checking) ========================
def text_encoder_reference(prompts, tokenized_prompts, compound_prompts, params):
    def ln(z, g, b):
        mu = z.mean(-1, keepdims=True)
        var = ((z - mu) ** 2).mean(-1, keepdims=True)
        return (z - mu) / jnp.sqrt(var + EPS) * g + b

    x = prompts + params["pos_emb"][None]
    counter = 0
    for layer in range(NUM_LAYERS):
        if layer > 0 and counter < len(compound_prompts):
            ctx = compound_prompts[counter]
            ctx_b = jnp.broadcast_to(ctx[None], (x.shape[0], N_CTX, D))
            x = jnp.concatenate([x[:, :1], ctx_b, x[:, 1 + N_CTX:]], axis=1)
            counter += 1
        w_qkv = params["w_qkv"][layer]; bqkv = params["b_qkv"][layer, 0]
        wq, wk, wv = w_qkv[:, :D], w_qkv[:, D:2 * D], w_qkv[:, 2 * D:]
        bq, bk, bv = bqkv[:D], bqkv[D:2 * D], bqkv[2 * D:]
        wo = params["w_o"][layer]; bo = params["b_o"][layer, 0]
        wfc = params["w_fc"][layer]; bfc = params["b_fc"][layer, 0]
        wpr = params["w_pr"][layer]; bpr = params["b_pr"][layer, 0]
        g1, b1, g2, b2 = params["ln"][layer]

        xh = ln(x, g1, b1)
        q = (xh @ wq + bq).reshape(B, L, H, DH).transpose(0, 2, 1, 3)
        k = (xh @ wk + bk).reshape(B, L, H, DH).transpose(0, 2, 1, 3)
        v = (xh @ wv + bv).reshape(B, L, H, DH).transpose(0, 2, 1, 3)
        s = jnp.einsum('bhld,bhmd->bhlm', q, k) / math.sqrt(DH)
        causal = jnp.where(jnp.arange(L)[None, :] <= jnp.arange(L)[:, None], 0.0, -1e9)
        p = jax.nn.softmax(s + causal, axis=-1)
        o = jnp.einsum('bhlm,bhmd->bhld', p, v).transpose(0, 2, 1, 3).reshape(B, L, D)
        x = x + o @ wo + bo

        xh = ln(x, g2, b2)
        hmid = xh @ wfc + bfc
        hmid = hmid * jax.nn.sigmoid(1.702 * hmid)
        x = x + hmid @ wpr + bpr

    xf = ln(x, params["lnf"][0], params["lnf"][1])
    eot = jnp.argmax(tokenized_prompts, axis=-1)
    sel = xf[jnp.arange(B), eot]
    return sel @ params["text_proj"]


# ========================================= main ==========================================
if __name__ == "__main__":
    key = jax.random.PRNGKey(0)
    k_p, k_t, k_c, k_w = jax.random.split(key, 4)

    prompts = 0.02 * jax.random.normal(k_p, (B, L, D), jnp.float32)
    tokenized_prompts = jax.random.randint(k_t, (B, L), 1, 100, jnp.int32)
    compound_prompts = [
        0.02 * jax.random.normal(jax.random.fold_in(k_c, i), (N_CTX, D), jnp.float32)
        for i in range(NUM_LAYERS - 1)
    ]
    params = init_params(k_w)

    fwd = jax.jit(text_encoder_forward)
    out = jax.block_until_ready(fwd(prompts, tokenized_prompts, compound_prompts, params))
    assert out.shape == (B, E), out.shape
    assert bool(jnp.all(jnp.isfinite(out)))

    with jax.default_matmul_precision("highest"):
        ref = jax.jit(text_encoder_reference)(prompts, tokenized_prompts,
                                              compound_prompts, params)
    ref = jax.block_until_ready(ref)
    err = float(jnp.max(jnp.abs(out - ref)))
    assert err < 5e-3, f"kernel/reference mismatch: max|diff|={err}"

    print("KERNEL_OK")
</pallas_src>

<mosaic_0001>
module attributes {stable_mosaic.version = 11 : i64} {
  func.func @fused_text_encoder_kernel(%arg0: memref<16x32xf32, #tpu.memory_space<vmem>>, %arg1: memref<16x32xf32, #tpu.memory_space<vmem>>, %arg2: memref<1x16x32xf32, #tpu.memory_space<vmem>>, %arg3: memref<8x16xf32, #tpu.memory_space<vmem>>, %arg4: memref<2x32x96xf32, #tpu.memory_space<vmem>>, %arg5: memref<2x1x96xf32, #tpu.memory_space<vmem>>, %arg6: memref<2x32x32xf32, #tpu.memory_space<vmem>>, %arg7: memref<2x1x32xf32, #tpu.memory_space<vmem>>, %arg8: memref<2x32x128xf32, #tpu.memory_space<vmem>>, %arg9: memref<2x1x128xf32, #tpu.memory_space<vmem>>, %arg10: memref<2x128x32xf32, #tpu.memory_space<vmem>>, %arg11: memref<2x1x32xf32, #tpu.memory_space<vmem>>, %arg12: memref<2x4x32xf32, #tpu.memory_space<vmem>>, %arg13: memref<2x32xf32, #tpu.memory_space<vmem>>, %arg14: memref<32x128xf32, #tpu.memory_space<vmem>>, %arg15: memref<8x128xf32, #tpu.memory_space<vmem>>) attributes {dimension_semantics = [], scalar_prefetch = 0 : i64, scratch_operands = 0 : i64, tpu.core_type = #tpu.core_type<tc>} {
    %0 = tpu.iota {dimensions = array<i32: 0>} : vector<64x16xi32>
    %1 = tpu.iota {dimensions = array<i32: 1>} : vector<64x16xi32>
    %c15_i32 = arith.constant 15 : i32
    %2 = vector.broadcast %c15_i32 : i32 to vector<64x16xi32>
    %3 = arith.andi %0, %2 : vector<64x16xi32>
    %c3_i32 = arith.constant 3 : i32
    %4 = vector.broadcast %c3_i32 : i32 to vector<64x16xi32>
    %5 = arith.shrsi %3, %4 : vector<64x16xi32>
    %c3_i32_0 = arith.constant 3 : i32
    %6 = vector.broadcast %c3_i32_0 : i32 to vector<64x16xi32>
    %7 = arith.shrsi %1, %6 : vector<64x16xi32>
    %8 = arith.cmpi eq, %5, %7 : vector<64x16xi32>
    %c7_i32 = arith.constant 7 : i32
    %9 = vector.broadcast %c7_i32 : i32 to vector<64x16xi32>
    %10 = arith.andi %1, %9 : vector<64x16xi32>
    %c7_i32_1 = arith.constant 7 : i32
    %11 = vector.broadcast %c7_i32_1 : i32 to vector<64x16xi32>
    %12 = arith.andi %3, %11 : vector<64x16xi32>
    %13 = arith.cmpi sle, %10, %12 : vector<64x16xi32>
    %14 = arith.andi %8, %13 : vector<64x16xi1>
    %cst = arith.constant 0.000000e+00 : f32
    %cst_2 = arith.constant -1.000000e+09 : f32
    %15 = vector.broadcast %cst : f32 to vector<64x16xf32>
    %16 = vector.broadcast %cst_2 : f32 to vector<64x16xf32>
    %17 = arith.select %14, %15, %16 : vector<64x16xi1>, vector<64x16xf32>
    %18 = tpu.iota {dimensions = array<i32: 0>} : vector<64x32xi32>
    %19 = tpu.iota {dimensions = array<i32: 1>} : vector<64x32xi32>
    %c3_i32_3 = arith.constant 3 : i32
    %20 = vector.broadcast %c3_i32_3 : i32 to vector<64x32xi32>
    %21 = arith.shrsi %19, %20 : vector<64x32xi32>
    %c4_i32 = arith.constant 4 : i32
    %22 = vector.broadcast %c4_i32 : i32 to vector<64x32xi32>
    %23 = arith.shrsi %18, %22 : vector<64x32xi32>
    %24 = arith.cmpi eq, %21, %23 : vector<64x32xi32>
    %25 = arith.extui %24 : vector<64x32xi1> to vector<64x32xi32>
    %26 = arith.sitofp %25 : vector<64x32xi32> to vector<64x32xf32>
    %cst_4 = arith.constant 0.353553385 : f32
    %27 = vector.broadcast %cst_4 : f32 to vector<64x32xf32>
    %28 = arith.mulf %26, %27 : vector<64x32xf32>
    %29 = tpu.iota {dimensions = array<i32: 0>} : vector<16x1xi32>
    %c7_i32_5 = arith.constant 7 : i32
    %30 = vector.broadcast %c7_i32_5 : i32 to vector<16x1xi32>
    %31 = arith.andi %29, %30 : vector<16x1xi32>
    %c1_i32 = arith.constant 1 : i32
    %32 = vector.broadcast %c1_i32 : i32 to vector<16x1xi32>
    %33 = arith.cmpi sge, %31, %32 : vector<16x1xi32>
    %c3_i32_6 = arith.constant 3 : i32
    %34 = vector.broadcast %c3_i32_6 : i32 to vector<16x1xi32>
    %35 = arith.cmpi slt, %31, %34 : vector<16x1xi32>
    %36 = arith.andi %33, %35 : vector<16x1xi1>
    %c0 = arith.constant 0 : index
    %c0_7 = arith.constant 0 : index
    %37 = vector.load %arg0[%c0, %c0_7] : memref<16x32xf32, #tpu.memory_space<vmem>>, vector<16x32xf32>
    %c0_8 = arith.constant 0 : index
    %c0_9 = arith.constant 0 : index
    %38 = vector.load %arg1[%c0_8, %c0_9] : memref<16x32xf32, #tpu.memory_space<vmem>>, vector<16x32xf32>
    %39 = arith.addf %37, %38 : vector<16x32xf32>
    %c0_10 = arith.constant 0 : index
    %c0_11 = arith.constant 0 : index
    %c0_12 = arith.constant 0 : index
    %40 = vector.load %arg4[%c0_10, %c0_11, %c0_12] : memref<2x32x96xf32, #tpu.memory_space<vmem>>, vector<1x32x96xf32>
    %41 = vector.shape_cast %40 : vector<1x32x96xf32> to vector<32x96xf32>
    %c0_13 = arith.constant 0 : index
    %c0_14 = arith.constant 0 : index
    %c0_15 = arith.constant 0 : index
    %42 = vector.load %arg5[%c0_13, %c0_14, %c0_15] : memref<2x1x96xf32, #tpu.memory_space<vmem>>, vector<1x1x96xf32>
    %43 = vector.shape_cast %42 : vector<1x1x96xf32> to vector<1x96xf32>
    %c0_16 = arith.constant 0 : index
    %c0_17 = arith.constant 0 : index
    %c0_18 = arith.constant 0 : index
    %44 = vector.load %arg6[%c0_16, %c0_17, %c0_18] : memref<2x32x32xf32, #tpu.memory_space<vmem>>, vector<1x32x32xf32>
    %45 = vector.shape_cast %44 : vector<1x32x32xf32> to vector<32x32xf32>
    %c0_19 = arith.constant 0 : index
    %c0_20 = arith.constant 0 : index
    %c0_21 = arith.constant 0 : index
    %46 = vector.load %arg7[%c0_19, %c0_20, %c0_21] : memref<2x1x32xf32, #tpu.memory_space<vmem>>, vector<1x1x32xf32>
    %47 = vector.shape_cast %46 : vector<1x1x32xf32> to vector<1x32xf32>
    %c0_22 = arith.constant 0 : index
    %c0_23 = arith.constant 0 : index
    %c0_24 = arith.constant 0 : index
    %48 = vector.load %arg8[%c0_22, %c0_23, %c0_24] : memref<2x32x128xf32, #tpu.memory_space<vmem>>, vector<1x32x128xf32>
    %49 = vector.shape_cast %48 : vector<1x32x128xf32> to vector<32x128xf32>
    %c0_25 = arith.constant 0 : index
    %c0_26 = arith.constant 0 : index
    %c0_27 = arith.constant 0 : index
    %50 = vector.load %arg9[%c0_25, %c0_26, %c0_27] : memref<2x1x128xf32, #tpu.memory_space<vmem>>, vector<1x1x128xf32>
    %51 = vector.shape_cast %50 : vector<1x1x128xf32> to vector<1x128xf32>
    %c0_28 = arith.constant 0 : index
    %c0_29 = arith.constant 0 : index
    %c0_30 = arith.constant 0 : index
    %52 = vector.load %arg10[%c0_28, %c0_29, %c0_30] : memref<2x128x32xf32, #tpu.memory_space<vmem>>, vector<1x128x32xf32>
    %53 = vector.shape_cast %52 : vector<1x128x32xf32> to vector<128x32xf32>
    %c0_31 = arith.constant 0 : index
    %c0_32 = arith.constant 0 : index
    %c0_33 = arith.constant 0 : index
    %54 = vector.load %arg11[%c0_31, %c0_32, %c0_33] : memref<2x1x32xf32, #tpu.memory_space<vmem>>, vector<1x1x32xf32>
    %55 = vector.shape_cast %54 : vector<1x1x32xf32> to vector<1x32xf32>
    %c0_34 = arith.constant 0 : index
    %c0_35 = arith.constant 0 : index
    %c0_36 = arith.constant 0 : index
    %56 = vector.load %arg12[%c0_34, %c0_35, %c0_36] : memref<2x4x32xf32, #tpu.memory_space<vmem>>, vector<1x1x32xf32>
    %57 = vector.shape_cast %56 : vector<1x1x32xf32> to vector<1x32xf32>
    %c0_37 = arith.constant 0 : index
    %c1 = arith.constant 1 : index
    %c0_38 = arith.constant 0 : index
    %58 = vector.load %arg12[%c0_37, %c1, %c0_38] : memref<2x4x32xf32, #tpu.memory_space<vmem>>, vector<1x1x32xf32>
    %59 = vector.shape_cast %58 : vector<1x1x32xf32> to vector<1x32xf32>
    %c0_39 = arith.constant 0 : index
    %c2 = arith.constant 2 : index
    %c0_40 = arith.constant 0 : index
    %60 = vector.load %arg12[%c0_39, %c2, %c0_40] : memref<2x4x32xf32, #tpu.memory_space<vmem>>, vector<1x1x32xf32>
    %61 = vector.shape_cast %60 : vector<1x1x32xf32> to vector<1x32xf32>
    %c0_41 = arith.constant 0 : index
    %c3 = arith.constant 3 : index
    %c0_42 = arith.constant 0 : index
    %62 = vector.load %arg12[%c0_41, %c3, %c0_42] : memref<2x4x32xf32, #tpu.memory_space<vmem>>, vector<1x1x32xf32>
    %63 = vector.shape_cast %62 : vector<1x1x32xf32> to vector<1x32xf32>
    %cst_43 = arith.constant dense<0.000000e+00> : vector<16xf32>
    %64 = vector.multi_reduction <add>, %39, %cst_43 [1] : vector<16x32xf32> to vector<16xf32>
    %65 = vector.shape_cast %64 : vector<16xf32> to vector<16x1xf32>
    %cst_44 = arith.constant 3.200000e+01 : f32
    %66 = vector.broadcast %cst_44 : f32 to vector<16x1xf32>
    %67 = arith.divf %65, %66 : vector<16x1xf32>
    %68 = vector.broadcast %67 : vector<16x1xf32> to vector<16x32xf32>
    %69 = arith.subf %39, %68 : vector<16x32xf32>
    %70 = arith.mulf %69, %69 : vector<16x32xf32>
    %cst_45 = arith.constant dense<0.000000e+00> : vector<16xf32>
    %71 = vector.multi_reduction <add>, %70, %cst_45 [1] : vector<16x32xf32> to vector<16xf32>
    %72 = vector.shape_cast %71 : vector<16xf32> to vector<16x1xf32>
    %cst_46 = arith.constant 3.200000e+01 : f32
    %73 = vector.broadcast %cst_46 : f32 to vector<16x1xf32>
    %74 = arith.divf %72, %73 : vector<16x1xf32>
    %75 = vector.broadcast %67 : vector<16x1xf32> to vector<16x32xf32>
    %76 = arith.subf %39, %75 : vector<16x32xf32>
    %cst_47 = arith.constant 9.99999974E-6 : f32
    %77 = vector.broadcast %cst_47 : f32 to vector<16x1xf32>
    %78 = arith.addf %74, %77 : vector<16x1xf32>
    %79 = math.rsqrt %78 : vector<16x1xf32>
    %80 = vector.broadcast %79 : vector<16x1xf32> to vector<16x32xf32>
    %81 = arith.mulf %76, %80 : vector<16x32xf32>
    %82 = vector.broadcast %57 : vector<1x32xf32> to vector<16x32xf32>
    %83 = arith.mulf %81, %82 : vector<16x32xf32>
    %84 = vector.broadcast %59 : vector<1x32xf32> to vector<16x32xf32>
    %85 = arith.addf %83, %84 : vector<16x32xf32>
    %cst_48 = arith.constant dense<0.000000e+00> : vector<16x96xf32>
    %86 = tpu.matmul %85, %41, %cst_48 {dimension_numbers = #tpu.dot_dimension_numbers<[1], [0], [0], [1], [0, 0, 1, 1], [], []>} : vector<16x32xf32>, vector<32x96xf32>, vector<16x96xf32> -> vector<16x96xf32>
    %87 = vector.broadcast %43 : vector<1x96xf32> to vector<16x96xf32>
    %88 = arith.addf %86, %87 : vector<16x96xf32>
    %89 = vector.extract_strided_slice %88 {offsets = [0, 0], sizes = [16, 32], strides = [1, 1]} : vector<16x96xf32> to vector<16x32xf32>
    %90 = vector.extract_strided_slice %88 {offsets = [0, 32], sizes = [16, 32], strides = [1, 1]} : vector<16x96xf32> to vector<16x32xf32>
    %91 = vector.extract_strided_slice %88 {offsets = [0, 64], sizes = [16, 32], strides = [1, 1]} : vector<16x96xf32> to vector<16x32xf32>
    %92 = tpu.concatenate %89, %89, %89, %89 in 0 : vector<16x32xf32>, vector<16x32xf32>, vector<16x32xf32>, vector<16x32xf32> -> vector<64x32xf32>
    %93 = arith.mulf %92, %28 : vector<64x32xf32>
    %cst_49 = arith.constant dense<0.000000e+00> : vector<64x16xf32>
    %94 = tpu.matmul %93, %90, %cst_49 {dimension_numbers = #tpu.dot_dimension_numbers<[1], [1], [0], [0], [0, 0, 1, 0], [], []>} : vector<64x32xf32>, vector<16x32xf32>, vector<64x16xf32> -> vector<64x16xf32>
    %95 = arith.addf %94, %17 : vector<64x16xf32>
    %cst_50 = arith.constant dense<0xFF800000> : vector<64xf32>
    %96 = vector.multi_reduction <maximumf>, %95, %cst_50 [1] : vector<64x16xf32> to vector<64xf32>
    %97 = vector.shape_cast %96 : vector<64xf32> to vector<64x1xf32>
    %98 = vector.broadcast %97 : vector<64x1xf32> to vector<64x16xf32>
    %99 = arith.subf %95, %98 : vector<64x16xf32>
    %100 = math.exp %99 : vector<64x16xf32>
    %cst_51 = arith.constant dense<0.000000e+00> : vector<64xf32>
    %101 = vector.multi_reduction <add>, %100, %cst_51 [1] : vector<64x16xf32> to vector<64xf32>
    %102 = vector.shape_cast %101 : vector<64xf32> to vector<64x1xf32>
    %103 = tpu.reciprocal %102 {approx = true} : vector<64x1xf32> -> vector<64x1xf32>
    %104 = vector.broadcast %103 : vector<64x1xf32> to vector<64x16xf32>
    %105 = arith.mulf %100, %104 : vector<64x16xf32>
    %cst_52 = arith.constant dense<0.000000e+00> : vector<64x32xf32>
    %106 = tpu.matmul %105, %91, %cst_52 {dimension_numbers = #tpu.dot_dimension_numbers<[1], [0], [0], [1], [0, 0, 1, 1], [], []>} : vector<64x16xf32>, vector<16x32xf32>, vector<64x32xf32> -> vector<64x32xf32>
    %107 = arith.mulf %106, %26 : vector<64x32xf32>
    %108 = vector.extract_strided_slice %107 {offsets = [0, 0], sizes = [16, 32], strides = [1, 1]} : vector<64x32xf32> to vector<16x32xf32>
    %109 = vector.extract_strided_slice %107 {offsets = [16, 0], sizes = [16, 32], strides = [1, 1]} : vector<64x32xf32> to vector<16x32xf32>
    %110 = arith.addf %108, %109 : vector<16x32xf32>
    %111 = vector.extract_strided_slice %107 {offsets = [32, 0], sizes = [16, 32], strides = [1, 1]} : vector<64x32xf32> to vector<16x32xf32>
    %112 = arith.addf %110, %111 : vector<16x32xf32>
    %113 = vector.extract_strided_slice %107 {offsets = [48, 0], sizes = [16, 32], strides = [1, 1]} : vector<64x32xf32> to vector<16x32xf32>
    %114 = arith.addf %112, %113 : vector<16x32xf32>
    %cst_53 = arith.constant dense<0.000000e+00> : vector<16x32xf32>
    %115 = tpu.matmul %114, %45, %cst_53 {dimension_numbers = #tpu.dot_dimension_numbers<[1], [0], [0], [1], [0, 0, 1, 1], [], []>} : vector<16x32xf32>, vector<32x32xf32>, vector<16x32xf32> -> vector<16x32xf32>
    %116 = arith.addf %39, %115 : vector<16x32xf32>
    %117 = vector.broadcast %47 : vector<1x32xf32> to vector<16x32xf32>
    %118 = arith.addf %116, %117 : vector<16x32xf32>
    %cst_54 = arith.constant dense<0.000000e+00> : vector<16xf32>
    %119 = vector.multi_reduction <add>, %118, %cst_54 [1] : vector<16x32xf32> to vector<16xf32>
    %120 = vector.shape_cast %119 : vector<16xf32> to vector<16x1xf32>
    %cst_55 = arith.constant 3.200000e+01 : f32
    %121 = vector.broadcast %cst_55 : f32 to vector<16x1xf32>
    %122 = arith.divf %120, %121 : vector<16x1xf32>
    %123 = vector.broadcast %122 : vector<16x1xf32> to vector<16x32xf32>
    %124 = arith.subf %118, %123 : vector<16x32xf32>
    %125 = arith.mulf %124, %124 : vector<16x32xf32>
    %cst_56 = arith.constant dense<0.000000e+00> : vector<16xf32>
    %126 = vector.multi_reduction <add>, %125, %cst_56 [1] : vector<16x32xf32> to vector<16xf32>
    %127 = vector.shape_cast %126 : vector<16xf32> to vector<16x1xf32>
    %cst_57 = arith.constant 3.200000e+01 : f32
    %128 = vector.broadcast %cst_57 : f32 to vector<16x1xf32>
    %129 = arith.divf %127, %128 : vector<16x1xf32>
    %130 = vector.broadcast %122 : vector<16x1xf32> to vector<16x32xf32>
    %131 = arith.subf %118, %130 : vector<16x32xf32>
    %cst_58 = arith.constant 9.99999974E-6 : f32
    %132 = vector.broadcast %cst_58 : f32 to vector<16x1xf32>
    %133 = arith.addf %129, %132 : vector<16x1xf32>
    %134 = math.rsqrt %133 : vector<16x1xf32>
    %135 = vector.broadcast %134 : vector<16x1xf32> to vector<16x32xf32>
    %136 = arith.mulf %131, %135 : vector<16x32xf32>
    %137 = vector.broadcast %61 : vector<1x32xf32> to vector<16x32xf32>
    %138 = arith.mulf %136, %137 : vector<16x32xf32>
    %139 = vector.broadcast %63 : vector<1x32xf32> to vector<16x32xf32>
    %140 = arith.addf %138, %139 : vector<16x32xf32>
    %cst_59 = arith.constant dense<0.000000e+00> : vector<16x128xf32>
    %141 = tpu.matmul %140, %49, %cst_59 {dimension_numbers = #tpu.dot_dimension_numbers<[1], [0], [0], [1], [0, 0, 1, 1], [], []>} : vector<16x32xf32>, vector<32x128xf32>, vector<16x128xf32> -> vector<16x128xf32>
    %142 = vector.broadcast %51 : vector<1x128xf32> to vector<16x128xf32>
    %143 = arith.addf %141, %142 : vector<16x128xf32>
    %cst_60 = arith.constant 1.702000e+00 : f32
    %144 = vector.broadcast %cst_60 : f32 to vector<16x128xf32>
    %145 = arith.mulf %144, %143 : vector<16x128xf32>
    %146 = arith.negf %145 : vector<16x128xf32>
    %147 = math.exp %146 : vector<16x128xf32>
    %cst_61 = arith.constant 1.000000e+00 : f32
    %148 = vector.broadcast %cst_61 : f32 to vector<16x128xf32>
    %149 = arith.addf %148, %147 : vector<16x128xf32>
    %150 = arith.divf %148, %149 : vector<16x128xf32>
    %151 = arith.mulf %143, %150 : vector<16x128xf32>
    %cst_62 = arith.constant dense<0.000000e+00> : vector<16x32xf32>
    %152 = tpu.matmul %151, %53, %cst_62 {dimension_numbers = #tpu.dot_dimension_numbers<[1], [0], [0], [1], [0, 0, 1, 1], [], []>} : vector<16x128xf32>, vector<128x32xf32>, vector<16x32xf32> -> vector<16x32xf32>
    %153 = arith.addf %118, %152 : vector<16x32xf32>
    %154 = vector.broadcast %55 : vector<1x32xf32> to vector<16x32xf32>
    %155 = arith.addf %153, %154 : vector<16x32xf32>
    %c0_63 = arith.constant 0 : index
    %c0_64 = arith.constant 0 : index
    %c0_65 = arith.constant 0 : index
    %156 = vector.load %arg2[%c0_63, %c0_64, %c0_65] : memref<1x16x32xf32, #tpu.memory_space<vmem>>, vector<1x16x32xf32>
    %157 = vector.shape_cast %156 : vector<1x16x32xf32> to vector<16x32xf32>
    %158 = vector.shape_cast %36 : vector<16x1xi1> to vector<16x1xi1>
    %159 = vector.broadcast %158 : vector<16x1xi1> to vector<16x32xi1>
    %160 = arith.select %159, %157, %155 : vector<16x32xi1>, vector<16x32xf32>
    %c1_66 = arith.constant 1 : index
    %c0_67 = arith.constant 0 : index
    %c0_68 = arith.constant 0 : index
    %161 = vector.load %arg4[%c1_66, %c0_67, %c0_68] : memref<2x32x96xf32, #tpu.memory_space<vmem>>, vector<1x32x96xf32>
    %162 = vector.shape_cast %161 : vector<1x32x96xf32> to vector<32x96xf32>
    %c1_69 = arith.constant 1 : index
    %c0_70 = arith.constant 0 : index
    %c0_71 = arith.constant 0 : index
    %163 = vector.load %arg5[%c1_69, %c0_70, %c0_71] : memref<2x1x96xf32, #tpu.memory_space<vmem>>, vector<1x1x96xf32>
    %164 = vector.shape_cast %163 : vector<1x1x96xf32> to vector<1x96xf32>
    %c1_72 = arith.constant 1 : index
    %c0_73 = arith.constant 0 : index
    %c0_74 = arith.constant 0 : index
    %165 = vector.load %arg6[%c1_72, %c0_73, %c0_74] : memref<2x32x32xf32, #tpu.memory_space<vmem>>, vector<1x32x32xf32>
    %166 = vector.shape_cast %165 : vector<1x32x32xf32> to vector<32x32xf32>
    %c1_75 = arith.constant 1 : index
    %c0_76 = arith.constant 0 : index
    %c0_77 = arith.constant 0 : index
    %167 = vector.load %arg7[%c1_75, %c0_76, %c0_77] : memref<2x1x32xf32, #tpu.memory_space<vmem>>, vector<1x1x32xf32>
    %168 = vector.shape_cast %167 : vector<1x1x32xf32> to vector<1x32xf32>
    %c1_78 = arith.constant 1 : index
    %c0_79 = arith.constant 0 : index
    %c0_80 = arith.constant 0 : index
    %169 = vector.load %arg8[%c1_78, %c0_79, %c0_80] : memref<2x32x128xf32, #tpu.memory_space<vmem>>, vector<1x32x128xf32>
    %170 = vector.shape_cast %169 : vector<1x32x128xf32> to vector<32x128xf32>
    %c1_81 = arith.constant 1 : index
    %c0_82 = arith.constant 0 : index
    %c0_83 = arith.constant 0 : index
    %171 = vector.load %arg9[%c1_81, %c0_82, %c0_83] : memref<2x1x128xf32, #tpu.memory_space<vmem>>, vector<1x1x128xf32>
    %172 = vector.shape_cast %171 : vector<1x1x128xf32> to vector<1x128xf32>
    %c1_84 = arith.constant 1 : index
    %c0_85 = arith.constant 0 : index
    %c0_86 = arith.constant 0 : index
    %173 = vector.load %arg10[%c1_84, %c0_85, %c0_86] : memref<2x128x32xf32, #tpu.memory_space<vmem>>, vector<1x128x32xf32>
    %174 = vector.shape_cast %173 : vector<1x128x32xf32> to vector<128x32xf32>
    %c1_87 = arith.constant 1 : index
    %c0_88 = arith.constant 0 : index
    %c0_89 = arith.constant 0 : index
    %175 = vector.load %arg11[%c1_87, %c0_88, %c0_89] : memref<2x1x32xf32, #tpu.memory_space<vmem>>, vector<1x1x32xf32>
    %176 = vector.shape_cast %175 : vector<1x1x32xf32> to vector<1x32xf32>
    %c1_90 = arith.constant 1 : index
    %c0_91 = arith.constant 0 : index
    %c0_92 = arith.constant 0 : index
    %177 = vector.load %arg12[%c1_90, %c0_91, %c0_92] : memref<2x4x32xf32, #tpu.memory_space<vmem>>, vector<1x1x32xf32>
    %178 = vector.shape_cast %177 : vector<1x1x32xf32> to vector<1x32xf32>
    %c1_93 = arith.constant 1 : index
    %c1_94 = arith.constant 1 : index
    %c0_95 = arith.constant 0 : index
    %179 = vector.load %arg12[%c1_93, %c1_94, %c0_95] : memref<2x4x32xf32, #tpu.memory_space<vmem>>, vector<1x1x32xf32>
    %180 = vector.shape_cast %179 : vector<1x1x32xf32> to vector<1x32xf32>
    %c1_96 = arith.constant 1 : index
    %c2_97 = arith.constant 2 : index
    %c0_98 = arith.constant 0 : index
    %181 = vector.load %arg12[%c1_96, %c2_97, %c0_98] : memref<2x4x32xf32, #tpu.memory_space<vmem>>, vector<1x1x32xf32>
    %182 = vector.shape_cast %181 : vector<1x1x32xf32> to vector<1x32xf32>
    %c1_99 = arith.constant 1 : index
    %c3_100 = arith.constant 3 : index
    %c0_101 = arith.constant 0 : index
    %183 = vector.load %arg12[%c1_99, %c3_100, %c0_101] : memref<2x4x32xf32, #tpu.memory_space<vmem>>, vector<1x1x32xf32>
    %184 = vector.shape_cast %183 : vector<1x1x32xf32> to vector<1x32xf32>
    %cst_102 = arith.constant dense<0.000000e+00> : vector<16xf32>
    %185 = vector.multi_reduction <add>, %160, %cst_102 [1] : vector<16x32xf32> to vector<16xf32>
    %186 = vector.shape_cast %185 : vector<16xf32> to vector<16x1xf32>
    %cst_103 = arith.constant 3.200000e+01 : f32
    %187 = vector.broadcast %cst_103 : f32 to vector<16x1xf32>
    %188 = arith.divf %186, %187 : vector<16x1xf32>
    %189 = vector.broadcast %188 : vector<16x1xf32> to vector<16x32xf32>
    %190 = arith.subf %160, %189 : vector<16x32xf32>
    %191 = arith.mulf %190, %190 : vector<16x32xf32>
    %cst_104 = arith.constant dense<0.000000e+00> : vector<16xf32>
    %192 = vector.multi_reduction <add>, %191, %cst_104 [1] : vector<16x32xf32> to vector<16xf32>
    %193 = vector.shape_cast %192 : vector<16xf32> to vector<16x1xf32>
    %cst_105 = arith.constant 3.200000e+01 : f32
    %194 = vector.broadcast %cst_105 : f32 to vector<16x1xf32>
    %195 = arith.divf %193, %194 : vector<16x1xf32>
    %196 = vector.broadcast %188 : vector<16x1xf32> to vector<16x32xf32>
    %197 = arith.subf %160, %196 : vector<16x32xf32>
    %cst_106 = arith.constant 9.99999974E-6 : f32
    %198 = vector.broadcast %cst_106 : f32 to vector<16x1xf32>
    %199 = arith.addf %195, %198 : vector<16x1xf32>
    %200 = math.rsqrt %199 : vector<16x1xf32>
    %201 = vector.broadcast %200 : vector<16x1xf32> to vector<16x32xf32>
    %202 = arith.mulf %197, %201 : vector<16x32xf32>
    %203 = vector.broadcast %178 : vector<1x32xf32> to vector<16x32xf32>
    %204 = arith.mulf %202, %203 : vector<16x32xf32>
    %205 = vector.broadcast %180 : vector<1x32xf32> to vector<16x32xf32>
    %206 = arith.addf %204, %205 : vector<16x32xf32>
    %cst_107 = arith.constant dense<0.000000e+00> : vector<16x96xf32>
    %207 = tpu.matmul %206, %162, %cst_107 {dimension_numbers = #tpu.dot_dimension_numbers<[1], [0], [0], [1], [0, 0, 1, 1], [], []>} : vector<16x32xf32>, vector<32x96xf32>, vector<16x96xf32> -> vector<16x96xf32>
    %208 = vector.broadcast %164 : vector<1x96xf32> to vector<16x96xf32>
    %209 = arith.addf %207, %208 : vector<16x96xf32>
    %210 = vector.extract_strided_slice %209 {offsets = [0, 0], sizes = [16, 32], strides = [1, 1]} : vector<16x96xf32> to vector<16x32xf32>
    %211 = vector.extract_strided_slice %209 {offsets = [0, 32], sizes = [16, 32], strides = [1, 1]} : vector<16x96xf32> to vector<16x32xf32>
    %212 = vector.extract_strided_slice %209 {offsets = [0, 64], sizes = [16, 32], strides = [1, 1]} : vector<16x96xf32> to vector<16x32xf32>
    %213 = tpu.concatenate %210, %210, %210, %210 in 0 : vector<16x32xf32>, vector<16x32xf32>, vector<16x32xf32>, vector<16x32xf32> -> vector<64x32xf32>
    %214 = arith.mulf %213, %28 : vector<64x32xf32>
    %cst_108 = arith.constant dense<0.000000e+00> : vector<64x16xf32>
    %215 = tpu.matmul %214, %211, %cst_108 {dimension_numbers = #tpu.dot_dimension_numbers<[1], [1], [0], [0], [0, 0, 1, 0], [], []>} : vector<64x32xf32>, vector<16x32xf32>, vector<64x16xf32> -> vector<64x16xf32>
    %216 = arith.addf %215, %17 : vector<64x16xf32>
    %cst_109 = arith.constant dense<0xFF800000> : vector<64xf32>
    %217 = vector.multi_reduction <maximumf>, %216, %cst_109 [1] : vector<64x16xf32> to vector<64xf32>
    %218 = vector.shape_cast %217 : vector<64xf32> to vector<64x1xf32>
    %219 = vector.broadcast %218 : vector<64x1xf32> to vector<64x16xf32>
    %220 = arith.subf %216, %219 : vector<64x16xf32>
    %221 = math.exp %220 : vector<64x16xf32>
    %cst_110 = arith.constant dense<0.000000e+00> : vector<64xf32>
    %222 = vector.multi_reduction <add>, %221, %cst_110 [1] : vector<64x16xf32> to vector<64xf32>
    %223 = vector.shape_cast %222 : vector<64xf32> to vector<64x1xf32>
    %224 = tpu.reciprocal %223 {approx = true} : vector<64x1xf32> -> vector<64x1xf32>
    %225 = vector.broadcast %224 : vector<64x1xf32> to vector<64x16xf32>
    %226 = arith.mulf %221, %225 : vector<64x16xf32>
    %cst_111 = arith.constant dense<0.000000e+00> : vector<64x32xf32>
    %227 = tpu.matmul %226, %212, %cst_111 {dimension_numbers = #tpu.dot_dimension_numbers<[1], [0], [0], [1], [0, 0, 1, 1], [], []>} : vector<64x16xf32>, vector<16x32xf32>, vector<64x32xf32> -> vector<64x32xf32>
    %228 = arith.mulf %227, %26 : vector<64x32xf32>
    %229 = vector.extract_strided_slice %228 {offsets = [0, 0], sizes = [16, 32], strides = [1, 1]} : vector<64x32xf32> to vector<16x32xf32>
    %230 = vector.extract_strided_slice %228 {offsets = [16, 0], sizes = [16, 32], strides = [1, 1]} : vector<64x32xf32> to vector<16x32xf32>
    %231 = arith.addf %229, %230 : vector<16x32xf32>
    %232 = vector.extract_strided_slice %228 {offsets = [32, 0], sizes = [16, 32], strides = [1, 1]} : vector<64x32xf32> to vector<16x32xf32>
    %233 = arith.addf %231, %232 : vector<16x32xf32>
    %234 = vector.extract_strided_slice %228 {offsets = [48, 0], sizes = [16, 32], strides = [1, 1]} : vector<64x32xf32> to vector<16x32xf32>
    %235 = arith.addf %233, %234 : vector<16x32xf32>
    %cst_112 = arith.constant dense<0.000000e+00> : vector<16x32xf32>
    %236 = tpu.matmul %235, %166, %cst_112 {dimension_numbers = #tpu.dot_dimension_numbers<[1], [0], [0], [1], [0, 0, 1, 1], [], []>} : vector<16x32xf32>, vector<32x32xf32>, vector<16x32xf32> -> vector<16x32xf32>
    %237 = arith.addf %160, %236 : vector<16x32xf32>
    %238 = vector.broadcast %168 : vector<1x32xf32> to vector<16x32xf32>
    %239 = arith.addf %237, %238 : vector<16x32xf32>
    %cst_113 = arith.constant dense<0.000000e+00> : vector<16xf32>
    %240 = vector.multi_reduction <add>, %239, %cst_113 [1] : vector<16x32xf32> to vector<16xf32>
    %241 = vector.shape_cast %240 : vector<16xf32> to vector<16x1xf32>
    %cst_114 = arith.constant 3.200000e+01 : f32
    %242 = vector.broadcast %cst_114 : f32 to vector<16x1xf32>
    %243 = arith.divf %241, %242 : vector<16x1xf32>
    %244 = vector.broadcast %243 : vector<16x1xf32> to vector<16x32xf32>
    %245 = arith.subf %239, %244 : vector<16x32xf32>
    %246 = arith.mulf %245, %245 : vector<16x32xf32>
    %cst_115 = arith.constant dense<0.000000e+00> : vector<16xf32>
    %247 = vector.multi_reduction <add>, %246, %cst_115 [1] : vector<16x32xf32> to vector<16xf32>
    %248 = vector.shape_cast %247 : vector<16xf32> to vector<16x1xf32>
    %cst_116 = arith.constant 3.200000e+01 : f32
    %249 = vector.broadcast %cst_116 : f32 to vector<16x1xf32>
    %250 = arith.divf %248, %249 : vector<16x1xf32>
    %251 = vector.broadcast %243 : vector<16x1xf32> to vector<16x32xf32>
    %252 = arith.subf %239, %251 : vector<16x32xf32>
    %cst_117 = arith.constant 9.99999974E-6 : f32
    %253 = vector.broadcast %cst_117 : f32 to vector<16x1xf32>
    %254 = arith.addf %250, %253 : vector<16x1xf32>
    %255 = math.rsqrt %254 : vector<16x1xf32>
    %256 = vector.broadcast %255 : vector<16x1xf32> to vector<16x32xf32>
    %257 = arith.mulf %252, %256 : vector<16x32xf32>
    %258 = vector.broadcast %182 : vector<1x32xf32> to vector<16x32xf32>
    %259 = arith.mulf %257, %258 : vector<16x32xf32>
    %260 = vector.broadcast %184 : vector<1x32xf32> to vector<16x32xf32>
    %261 = arith.addf %259, %260 : vector<16x32xf32>
    %cst_118 = arith.constant dense<0.000000e+00> : vector<16x128xf32>
    %262 = tpu.matmul %261, %170, %cst_118 {dimension_numbers = #tpu.dot_dimension_numbers<[1], [0], [0], [1], [0, 0, 1, 1], [], []>} : vector<16x32xf32>, vector<32x128xf32>, vector<16x128xf32> -> vector<16x128xf32>
    %263 = vector.broadcast %172 : vector<1x128xf32> to vector<16x128xf32>
    %264 = arith.addf %262, %263 : vector<16x128xf32>
    %cst_119 = arith.constant 1.702000e+00 : f32
    %265 = vector.broadcast %cst_119 : f32 to vector<16x128xf32>
    %266 = arith.mulf %265, %264 : vector<16x128xf32>
    %267 = arith.negf %266 : vector<16x128xf32>
    %268 = math.exp %267 : vector<16x128xf32>
    %cst_120 = arith.constant 1.000000e+00 : f32
    %269 = vector.broadcast %cst_120 : f32 to vector<16x128xf32>
    %270 = arith.addf %269, %268 : vector<16x128xf32>
    %271 = arith.divf %269, %270 : vector<16x128xf32>
    %272 = arith.mulf %264, %271 : vector<16x128xf32>
    %cst_121 = arith.constant dense<0.000000e+00> : vector<16x32xf32>
    %273 = tpu.matmul %272, %174, %cst_121 {dimension_numbers = #tpu.dot_dimension_numbers<[1], [0], [0], [1], [0, 0, 1, 1], [], []>} : vector<16x128xf32>, vector<128x32xf32>, vector<16x32xf32> -> vector<16x32xf32>
    %274 = arith.addf %239, %273 : vector<16x32xf32>
    %275 = vector.broadcast %176 : vector<1x32xf32> to vector<16x32xf32>
    %276 = arith.addf %274, %275 : vector<16x32xf32>
    %c0_122 = arith.constant 0 : index
    %c0_123 = arith.constant 0 : index
    %277 = vector.load %arg3[%c0_122, %c0_123] : memref<8x16xf32, #tpu.memory_space<vmem>>, vector<8x16xf32>
    %cst_124 = arith.constant dense<0.000000e+00> : vector<8x32xf32>
    %278 = tpu.matmul %277, %276, %cst_124 {dimension_numbers = #tpu.dot_dimension_numbers<[1], [0], [0], [1], [0, 0, 1, 1], [], []>} : vector<8x16xf32>, vector<16x32xf32>, vector<8x32xf32> -> vector<8x32xf32>
    %c0_125 = arith.constant 0 : index
    %c0_126 = arith.constant 0 : index
    %279 = vector.load %arg13[%c0_125, %c0_126] : memref<2x32xf32, #tpu.memory_space<vmem>>, vector<1x32xf32>
    %c1_127 = arith.constant 1 : index
    %c0_128 = arith.constant 0 : index
    %280 = vector.load %arg13[%c1_127, %c0_128] : memref<2x32xf32, #tpu.memory_space<vmem>>, vector<1x32xf32>
    %cst_129 = arith.constant dense<0.000000e+00> : vector<8xf32>
    %281 = vector.multi_reduction <add>, %278, %cst_129 [1] : vector<8x32xf32> to vector<8xf32>
    %282 = vector.shape_cast %281 : vector<8xf32> to vector<8x1xf32>
    %cst_130 = arith.constant 3.200000e+01 : f32
    %283 = vector.broadcast %cst_130 : f32 to vector<8x1xf32>
    %284 = arith.divf %282, %283 : vector<8x1xf32>
    %285 = vector.broadcast %284 : vector<8x1xf32> to vector<8x32xf32>
    %286 = arith.subf %278, %285 : vector<8x32xf32>
    %287 = arith.mulf %286, %286 : vector<8x32xf32>
    %cst_131 = arith.constant dense<0.000000e+00> : vector<8xf32>
    %288 = vector.multi_reduction <add>, %287, %cst_131 [1] : vector<8x32xf32> to vector<8xf32>
    %289 = vector.shape_cast %288 : vector<8xf32> to vector<8x1xf32>
    %cst_132 = arith.constant 3.200000e+01 : f32
    %290 = vector.broadcast %cst_132 : f32 to vector<8x1xf32>
    %291 = arith.divf %289, %290 : vector<8x1xf32>
    %292 = vector.broadcast %284 : vector<8x1xf32> to vector<8x32xf32>
    %293 = arith.subf %278, %292 : vector<8x32xf32>
    %cst_133 = arith.constant 9.99999974E-6 : f32
    %294 = vector.broadcast %cst_133 : f32 to vector<8x1xf32>
    %295 = arith.addf %291, %294 : vector<8x1xf32>
    %296 = math.rsqrt %295 : vector<8x1xf32>
    %297 = vector.broadcast %296 : vector<8x1xf32> to vector<8x32xf32>
    %298 = arith.mulf %293, %297 : vector<8x32xf32>
    %299 = vector.broadcast %279 : vector<1x32xf32> to vector<8x32xf32>
    %300 = arith.mulf %298, %299 : vector<8x32xf32>
    %301 = vector.broadcast %280 : vector<1x32xf32> to vector<8x32xf32>
    %302 = arith.addf %300, %301 : vector<8x32xf32>
    %c0_134 = arith.constant 0 : index
    %c0_135 = arith.constant 0 : index
    %303 = vector.load %arg14[%c0_134, %c0_135] : memref<32x128xf32, #tpu.memory_space<vmem>>, vector<32x128xf32>
    %cst_136 = arith.constant dense<0.000000e+00> : vector<8x128xf32>
    %304 = tpu.matmul %302, %303, %cst_136 {dimension_numbers = #tpu.dot_dimension_numbers<[1], [0], [0], [1], [0, 0, 1, 1], [], []>} : vector<8x32xf32>, vector<32x128xf32>, vector<8x128xf32> -> vector<8x128xf32>
    %c0_137 = arith.constant 0 : index
    %c0_138 = arith.constant 0 : index
    %305 = vector.load %arg15[%c0_137, %c0_138] : memref<8x128xf32, #tpu.memory_space<vmem>>, vector<8x128xf32>
    tpu.vector_store %arg15[%c0_137, %c0_138], %304 {strides = array<i32>} : memref<8x128xf32, #tpu.memory_space<vmem>>, vector<8x128xf32>,
    return
  }
}

</mosaic_0001>

<bundles_post_ra>
// kernel: text_encoder_forward.1
= control target key start
LH: loop header
LB: loop body
LE: loop exit
PB: predicated region body
PF: predicated region fallthrough
CT: control target
= control target key end

     0   :  { %vm209_vm0 = vcmask 261120   ;;  %v50_v38 = vlaneseq  ;;  %v2655_v44 = vmov 0.0   ;;  %s2656_s23 = smov 96   ;;  %s2658_s24 = smov 64   ;;  %s3385_s0 = inlined_call_operand.vmem [shape: f32[16,32], index: 0, kind: input, shape index: {}]   ;;  %s3386_s1 = inlined_call_operand.vmem [shape: f32[16,32], index: 1, kind: input, shape index: {}]   ;;  %s3387_s4 = inlined_call_operand.vmem [shape: f32[2,32,96], index: 4, kind: input, shape index: {}]   ;;  %s3388_s12 = inlined_call_operand.vmem [shape: f32[2,4,32], index: 12, kind: input, shape index: {}]   ;;  %s3389_s5 = inlined_call_operand.vmem [shape: f32[2,1,96], index: 5, kind: input, shape index: {}]   ;;  %s3390_s6 = inlined_call_operand.vmem [shape: f32[2,32,32], index: 6, kind: input, shape index: {}]   ;;  %s3391_s7 = inlined_call_operand.vmem [shape: f32[2,1,32], index: 7, kind: input, shape index: {}]   ;;  %s3392_s8 = inlined_call_operand.vmem [shape: f32[2,32,128], index: 8, kind: input, shape index: {}]   ;;  %s3393_s10 = inlined_call_operand.vmem [shape: f32[2,128,32], index: 10, kind: input, shape index: {}]   ;;  %s3394_s9 = inlined_call_operand.vmem [shape: f32[2,1,128], index: 9, kind: input, shape index: {}]   ;;  %s3395_s11 = inlined_call_operand.vmem [shape: f32[2,1,32], index: 11, kind: input, shape index: {}]   ;;  %s3396_s2 = inlined_call_operand.vmem [shape: f32[1,16,32], index: 2, kind: input, shape index: {}]   ;;  %s3397_s3 = inlined_call_operand.vmem [shape: f32[8,16], index: 3, kind: input, shape index: {}]   ;;  %s3398_s14 = inlined_call_operand.vmem [shape: f32[32,128], index: 14, kind: input, shape index: {}]   ;;  %s3399_s13 = inlined_call_operand.vmem [shape: f32[2,32], index: 13, kind: input, shape index: {}]   ;;  %s3400_s15 = inlined_call_operand.vmem [shape: f32[8,128], index: 15, kind: output, shape index: {}]  }
   0x1   :  { %v167_v0 = vld [vmem:[%s3385_s0] sm:$0xff]  ;;  %v168_v2 = vld [vmem:[%s3385_s0 + $0x8] sm:$0xff]  ;;  %v176_v18 = vld [vmem:[%s3387_s4 + $0x18] sm:$0xff] }
   0x2   :  { %v169_v1 = vld [vmem:[%s3386_s1] sm:$0xff]  ;;  %v170_v4 = vld [vmem:[%s3386_s1 + $0x8] sm:$0xff]  ;;  %v175_v19 = vld [vmem:[%s3387_s4 + $0x10] sm:$0xff]  ;;  %2334 = vmatprep.subr.mxu0 %v176_v18  ;;  %v2784_v39 = vshrl.u32 %v50_v38, 7  ;;  %v2786_v40 = vand.u32 127, %v50_v38 }
   0x3   :  { %v2749_v3 = vadd.f32 %v169_v1, %v167_v0  ;;  %v2754_v5 = vadd.f32 %v170_v4, %v168_v2  ;;  %2335 = vmatpush3.msra.mxu0 %v176_v18  ;;  %v174_v20 = vld [vmem:[%s3387_s4 + $0x8] sm:$0xff]  ;;  %v173_v21 = vld [vmem:[%s3387_s4] sm:$0xff] }
   0x4   :  { %2336 = vmatprep.subr.mxu0 %v175_v19  ;;  %v2106_v29 = vld [vmem:[%s3388_s12] ss:$0 sm:$0xff]  ;;  %v2107_v31 = vld [vmem:[%s3388_s12 + $0x1] ss:$0 sm:$0xff]  ;;  %v119_v41 = vshra.s32 %v2784_v39, 4  ;;  %v2790_v42 = vshra.s32 %v2786_v40, 3 }
   0x5   :  { %v210_v6 = vsel %vm209_vm0, %v2749_v3, 0.0  ;;  %v213_v7 = vsel %vm209_vm0, %v2754_v5, 0.0  ;;  %2337 = vmatpush3.msra.mxu0 %v175_v19  ;;  %v2108_v43 = vld [vmem:[%s3389_s5] ss:$0 sm:$0xff]  ;;  %v2814_v52 = vadd.s32 8, %v2784_v39  ;;  %v2817_v53 = vadd.s32 16, %v2784_v39 }
   0x6   :  { %211 = vadd.xlane.f32.xlu0 %v210_v6  ;;  %2338 = vmatprep.subr.mxu0 %v174_v20  ;;  %vm127_vm1 = vcmp.eq.s32.totalorder %v2790_v42, %v119_v41  ;;  %v2821_v55 = vadd.s32 24, %v2784_v39  ;;  %v2825_v57 = vadd.s32 32, %v2784_v39  ;;  %v2830_v59 = vadd.s32 40, %v2784_v39 }
   0x7   :  { %2339 = vmatpush3.msra.mxu0 %v174_v20  ;;  %v2797_v45 = vsel %vm127_vm1, 1.0, %v2655_v44  ;;  %v120_v54 = vshra.s32 %v2814_v52, 4  ;;  %v121_v56 = vshra.s32 %v2817_v53, 4  ;;  %v2835_v61 = vadd.s32 48, %v2784_v39 }
   0x8   :  { %2340 = vmatprep.subr.mxu0 %v173_v21  ;;  %v2802_v48 = vmul.f32 0.35355338, %v2797_v45  ;;  %v122_v58 = vshra.s32 %v2821_v55, 4  ;;  %v123_v60 = vshra.s32 %v2825_v57, 4  ;;  %v124_v1 = vshra.s32 %v2830_v59, 4 }
   0x9   :  { %2341 = vmatpush3.msra.mxu0 %v173_v21  ;;  %vm128_vm2 = vcmp.eq.s32.totalorder %v2790_v42, %v120_v54  ;;  %vm129_vm3 = vcmp.eq.s32.totalorder %v2790_v42, %v121_v56  ;;  %v2847_v2 = vadd.s32 56, %v2784_v39  ;;  %v125_v6 = vshra.s32 %v2835_v61, 4 }
   0xa   :  { %214 = vadd.xlane.f32.xlu0 %v213_v7  ;;  %v2838_v63 = vsel %vm128_vm2, 1.0, %v2655_v44  ;;  %v2842_v0 = vsel %vm129_vm3, 1.0, %v2655_v44  ;;  %vm130_vm4 = vcmp.eq.s32.totalorder %v2790_v42, %v122_v58  ;;  %vm131_vm5 = vcmp.eq.s32.totalorder %v2790_v42, %v123_v60 }
   0xb   :  { %v2854_v7 = vmul.f32 0.35355338, %v2838_v63  ;;  %vm132_vm6 = vcmp.eq.s32.totalorder %v2790_v42, %v124_v1  ;;  %vm133_vm7 = vcmp.eq.s32.totalorder %v2790_v42, %v125_v6  ;;  %v66_v38 = vand.u32 15, %v2830_v59 }
  0x8f   :  { %v212_v8 = vpop.xlane.xlu0 %211 }
  0x90   :  { %v217_v9 = vmul.f32 0.03125, %v212_v8  ;;  %v2857_v8 = vmul.f32 0.35355338, %v2842_v0 }
  0x92   :  { %v219_v10 = vsub.f32 %v2749_v3, %v217_v9  ;;  %v2860_v9 = vsel %vm130_vm4, 1.0, %v2655_v44 }
  0x93   :  { %v215_v11 = vpop.xlane.xlu0 %214 }
  0x94   :  { %v218_v12 = vmul.f32 0.03125, %v215_v11  ;;  %v221_v13 = vmul.f32 %v219_v10, %v219_v10  ;;  %v126_v11 = vshra.s32 %v2847_v2, 4 }
  0x96   :  { %v220_v14 = vsub.f32 %v2754_v5, %v218_v12  ;;  %v223_v15 = vsel %vm209_vm0, %v221_v13, 0.0  ;;  %v2872_v13 = vmul.f32 0.35355338, %v2860_v9  ;;  %vm134_vm8 = vcmp.eq.s32.totalorder %v2790_v42, %v126_v11 }
  0x97   :  { %224 = vadd.xlane.f32.xlu1 %v223_v15 }
  0x98   :  { %v222_v16 = vmul.f32 %v220_v14, %v220_v14 }
  0x9a   :  { %v226_v17 = vsel %vm209_vm0, %v222_v16, 0.0  ;;  %v2880_v16 = vsel %vm132_vm6, 1.0, %v2655_v44 }
  0x9b   :  { %227 = vadd.xlane.f32.xlu1 %v226_v17  ;;  %v2884_v17 = vsel %vm133_vm7, 1.0, %v2655_v44  ;;  %v2891_v19 = vmul.f32 0.35355338, %v2880_v16 }
  0x9c   :  { %v2896_v21 = vmul.f32 0.35355338, %v2884_v17 }
 0x120   :  { %v225_v22 = vpop.xlane.xlu1 %224 }
 0x121   :  { %v229_v23 = vmul.f32 0.03125, %v225_v22  ;;  %v2899_v22 = vsel %vm134_vm8, 1.0, %v2655_v44 }
 0x123   :  { %v231_v24 = vadd.f32 1e-05, %v229_v23 }
 0x124   :  { %v228_v25 = vpop.xlane.xlu1 %227 }
 0x125   :  { %2557 = vrsqrt.f32 %v231_v24  ;;  %v230_v26 = vmul.f32 0.03125, %v228_v25  ;;  %v2906_v24 = vmul.f32 0.35355338, %v2899_v22 }
 0x127   :  { %v232_v27 = vadd.f32 1e-05, %v230_v26 }
 0x129   :  { %2559 = vrsqrt.f32 %v232_v27  ;;  %v62_v27 = vand.u32 15, %v2814_v52 }
 0x132   :  { %v2558_v28 = vpop.eup %2557 }
 0x133   :  { %v235_v30 = vmul.f32 %v2558_v28, %v219_v10  ;;  %v2863_v10 = vsel %vm131_vm5, 1.0, %v2655_v44  ;;  %v61_v28 = vand.u32 15, %v2784_v39  ;;  %vm483_vm5 = vcmask 130048  }
 0x134   :  { %v2877_v15 = vmul.f32 0.35355338, %v2863_v10 }
 0x135   :  { %v241_v32 = vmul.f32 %v2106_v29, %v235_v30  ;;  %v2918_v30 = vand.u32 7, %v2786_v40 }
 0x136   :  { %v2560_v33 = vpop.eup %2559 }
 0x137   :  { %v236_v34 = vmul.f32 %v2560_v33, %v220_v14  ;;  %v247_v35 = vadd.f32 %v2107_v31, %v241_v32  ;;  %v64_v32 = vand.u32 15, %v2821_v55  ;;  %v69_v33 = vshra.s32 %v61_v28, 3 }
 0x139   :  { %v242_v36 = vmul.f32 %v2106_v29, %v236_v34  ;;  %2342 = vmatprep.mubr.msk.f32.mxu0 %vm209_vm0, %v247_v35  ;;  %v70_v29 = vshra.s32 %v62_v27, 3  ;;  %v87_v34 = vand.u32 7, %v61_v28  ;;  %v63_v35 = vand.u32 15, %v2817_v53 }
 0x13a   :  { %vm78_vm11 = vcmp.eq.s32.totalorder %v69_v33, %v2790_v42  ;;  %v2657_v53 = vmov -1e+09  }
 0x13b   :  { %v248_v37 = vadd.f32 %v2107_v31, %v242_v36  ;;  %v88_v31 = vand.u32 7, %v62_v27  ;;  %vm79_vm9 = vcmp.eq.s32.totalorder %v70_v29, %v2790_v42  ;;  %v72_v36 = vshra.s32 %v64_v32, 3 }
 0x13c   :  { %vm95_vm12 = vcmp.le.s32.totalorder %v2918_v30, %v87_v34  ;;  %v71_v40 = vshra.s32 %v63_v35, 3  ;;  %v89_v41 = vand.u32 7, %v63_v35 }
 0x13d   :  { %2343 = vmatmul.mubr.msk.f32.vlgmr.msra.gmra.mxu0 %vm209_vm0, %v248_v37  ;;  %vm96_vm10 = vcmp.le.s32.totalorder %v2918_v30, %v88_v31  ;;  %v90_v37 = vand.u32 7, %v64_v32  ;;  %vm81_vm14 = vcmp.eq.s32.totalorder %v72_v36, %v2790_v42  ;;  %vm103_vm1 = vmand %vm78_vm11, %vm95_vm12 }
 0x13e   :  { %vm104_vm13 = vmand %vm79_vm9, %vm96_vm10  ;;  %vm80_vm2 = vcmp.eq.s32.totalorder %v71_v40, %v2790_v42  ;;  %vm97_vm4 = vcmp.le.s32.totalorder %v2918_v30, %v89_v41  ;;  %v2936_v58 = vsel %vm103_vm1, 0.0, %v2657_v53 }
 0x13f   :  { %vm98_vm15 = vcmp.le.s32.totalorder %v2918_v30, %v90_v37  ;;  %v2931_v54 = vsel %vm104_vm13, 0.0, %v2657_v53  ;;  %vm105_vm8 = vmand %vm80_vm2, %vm97_vm4 }
 0x140   :  { %vm106_vm3 = vmand %vm81_vm14, %vm98_vm15 }
 0x1fd   :  { %v2344_v46 = vpop.f32.mrf.mxu0 }
 0x1fe   :  { %v2799_v47 = vadd.f32 %v2344_v46, %v2108_v43  ;;  %v74_v46 = vshra.s32 %v66_v38, 3 }
 0x1ff   :  { %v327_v49 = vpop.f32.mrf.mxu0 }
 0x200   :  { %v2804_v50 = vadd.f32 %v2108_v43, %v327_v49  ;;  %348 = vrot.lane.b32.xlu0 %v2799_v47, %s2656_s23  ;;  %v337_v12 = vmul.f32 %v2799_v47, %v2854_v7  ;;  %v339_v18 = vmul.f32 %v2799_v47, %v2872_v13  ;;  %v341_v23 = vmul.f32 %v2799_v47, %v2891_v19 }
 0x201   :  { %v343_v26 = vmul.f32 %v2799_v47, %v2906_v24  ;;  %v65_v43 = vand.u32 15, %v2825_v57  ;;  %v92_v49 = vand.u32 7, %v66_v38  ;;  %v67_v57 = vand.u32 15, %v2835_v61 }
 0x202   :  { %346 = vrot.lane.b32.xlu1 %v2804_v50, %s2656_s23  ;;  %v336_v51 = vmul.f32 %v2804_v50, %v2802_v48  ;;  %v338_v14 = vmul.f32 %v2804_v50, %v2857_v8  ;;  %v340_v20 = vmul.f32 %v2804_v50, %v2877_v15  ;;  %v342_v25 = vmul.f32 %v2804_v50, %v2896_v21 }
 0x203   :  { %v73_v55 = vshra.s32 %v65_v43, 3  ;;  %v91_v56 = vand.u32 7, %v65_v43  ;;  %vm83_vm6 = vcmp.eq.s32.totalorder %v74_v46, %v2790_v42  ;;  %vm100_vm7 = vcmp.le.s32.totalorder %v2918_v30, %v92_v49 }
 0x204   :  { %2349 = vmatprep.mubr.msk.f32.mxu1 %vm209_vm0, %v336_v51  ;;  %v68_v51 = vand.u32 15, %v2847_v2  ;;  %v2941_v2 = vsel %vm106_vm3, 0.0, %v2657_v53  ;;  %v75_v61 = vshra.s32 %v67_v57, 3  ;;  %v93_v6 = vand.u32 7, %v67_v57  ;;  %vm108_vm11 = vmand %vm83_vm6, %vm100_vm7 }
 0x205   :  { %vm82_vm9 = vcmp.eq.s32.totalorder %v73_v55, %v2790_v42  ;;  %vm99_vm10 = vcmp.le.s32.totalorder %v2918_v30, %v91_v56 }
 0x206   :  { %v76_v60 = vshra.s32 %v68_v51, 3  ;;  %vm107_vm14 = vmand %vm82_vm9, %vm99_vm10  ;;  %vm84_vm15 = vcmp.eq.s32.totalorder %v75_v61, %v2790_v42  ;;  %vm101_vm1 = vcmp.le.s32.totalorder %v2918_v30, %v93_v6 }
 0x207   :  { %v2960_v29 = vsel %vm107_vm14, 0.0, %v2657_v53  ;;  %vm109_vm3 = vmand %vm84_vm15, %vm101_vm1 }
 0x208   :  { %vm85_vm12 = vcmp.eq.s32.totalorder %v76_v60, %v2790_v42  ;;  %v2968_v36 = vsel %vm109_vm3, 0.0, %v2657_v53 }
 0x272   :  { %v349_v62 = vpop.permute.xlu0 %348 }
 0x273   :  { %2345 = vmatprep.subr.msk.mxu1 %vm209_vm0, %v349_v62 }
 0x274   :  { %2346 = vmatpush3.xpose.msk.msra.mxu1 %vm209_vm0, %v349_v62  ;;  %v347_v4 = vpop.permute.xlu1 %346  ;;  %v94_v62 = vand.u32 7, %v68_v51 }
 0x275   :  { %2347 = vmatprep.subr.msk.mxu1 %vm209_vm0, %v347_v4 }
 0x276   :  { %vm102_vm13 = vcmp.le.s32.totalorder %v2918_v30, %v94_v62 }
 0x277   :  { %vm110_vm2 = vmand %vm85_vm12, %vm102_vm13 }
 0x278   :  { %2348 = vmatpush3.xpose.msk.msra.mxu1 %vm209_vm0, %v347_v4  ;;  %v2965_v35 = vsel %vm110_vm2, 0.0, %v2657_v53 }
 0x27b   :  { %2350 = vmatmul.mubr.msk.f32.vlgmr.msra.gmra.mxu1 %vm209_vm0, %v337_v12 }
 0x27c   :  { %2352 = vmatprep.mubr.msk.f32.mxu1 %vm209_vm0, %v338_v14 }
 0x27f   :  { %2353 = vmatmul.mubr.msk.f32.gmra.mxu1 %vm209_vm0, %v339_v18  ;;  %v2949_v18 = vsel %vm105_vm8, 0.0, %v2657_v53 }
 0x280   :  { %2355 = vmatprep.mubr.msk.f32.mxu1 %vm209_vm0, %v340_v20 }
 0x283   :  { %2356 = vmatmul.mubr.msk.f32.gmra.mxu1 %vm209_vm0, %v341_v23 }
 0x284   :  { %2358 = vmatprep.mubr.msk.f32.mxu1 %vm209_vm0, %v342_v25 }
 0x287   :  { %2359 = vmatmul.mubr.msk.f32.gmra.mxu1 %vm209_vm0, %v343_v26  ;;  %v2955_v26 = vsel %vm108_vm11, 0.0, %v2657_v53  ;;  %vm2659_vm11 = vmmov 0  }
 0x33b   :  { %v2351_v59 = vpop.f32.mrf.mxu1 }
 0x33c   :  { %v450_v1 = vadd.f32 %v2351_v59, %v2931_v54 }
 0x33d   :  { %v444_v4 = vpop.f32.mrf.mxu1 }
 0x33e   :  { %v445_v11 = vadd.f32 %v444_v4, %v2936_v58  ;;  %v487_v12 = vsel %vm483_vm5, %v450_v1, -inf }
 0x33f   :  { %488 = vmax.xlane.f32.xlu0 %v487_v12  ;;  %v2354_v14 = vpop.f32.mrf.mxu1 }
 0x340   :  { %v460_v20 = vadd.f32 %v2354_v14, %v2941_v2  ;;  %v484_v23 = vsel %vm483_vm5, %v445_v11, -inf }
 0x341   :  { %v454_v25 = vpop.f32.mrf.mxu1  ;;  %485 = vmax.xlane.f32.xlu1 %v484_v23 }
 0x342   :  { %v455_v27 = vadd.f32 %v454_v25, %v2949_v18  ;;  %v493_v33 = vsel %vm483_vm5, %v460_v20, -inf }
 0x343   :  { %v2357_v28 = vpop.f32.mrf.mxu1 }
 0x344   :  { %v470_v31 = vadd.f32 %v2357_v28, %v2955_v26  ;;  %v490_v32 = vsel %vm483_vm5, %v455_v27, -inf }
 0x345   :  { %v464_v34 = vpop.f32.mrf.mxu1  ;;  %491 = vmax.xlane.f32.xlu0 %v490_v32  ;;  %494 = vmax.xlane.f32.xlu1 %v493_v33 }
 0x346   :  { %v465_v42 = vadd.f32 %v464_v34, %v2960_v29  ;;  %v499_v40 = vsel %vm483_vm5, %v470_v31, -inf }
 0x347   :  { %v2360_v30 = vpop.f32.mrf.mxu1 }
 0x348   :  { %v480_v37 = vadd.f32 %v2360_v30, %v2965_v35  ;;  %v496_v38 = vsel %vm483_vm5, %v465_v42, -inf }
 0x349   :  { %v474_v41 = vpop.f32.mrf.mxu1  ;;  %497 = vmax.xlane.f32.xlu0 %v496_v38  ;;  %500 = vmax.xlane.f32.xlu1 %v499_v40 }
 0x34a   :  { %v475_v43 = vadd.f32 %v474_v41, %v2968_v36  ;;  %v505_v49 = vsel %vm483_vm5, %v480_v37, -inf }
 0x34c   :  { %v502_v46 = vsel %vm483_vm5, %v475_v43, -inf }
 0x34d   :  { %503 = vmax.xlane.f32.xlu0 %v502_v46  ;;  %506 = vmax.xlane.f32.xlu1 %v505_v49 }
 0x3c8   :  { %v489_v51 = vpop.xlane.xlu0 %488 }
 0x3c9   :  { %v509_v53 = vsub.f32 %v450_v1, %v489_v51 }
 0x3ca   :  { %v486_v55 = vpop.xlane.xlu1 %485 }
 0x3cb   :  { %v518_v56 = vmul.f32 1.442695, %v509_v53  ;;  %v508_v57 = vsub.f32 %v445_v11, %v486_v55 }
 0x3cd   :  { %2561 = vpow2.f32 %v518_v56  ;;  %v516_v59 = vmul.f32 1.442695, %v508_v57 }
 0x3ce   :  { %v492_v60 = vpop.xlane.xlu0 %491  ;;  %v495_v62 = vpop.xlane.xlu1 %494 }
 0x3cf   :  { %2563 = vpow2.f32 %v516_v59  ;;  %v510_v4 = vsub.f32 %v455_v27, %v492_v60  ;;  %v511_v61 = vsub.f32 %v460_v20, %v495_v62 }
 0x3d1   :  { %v520_v6 = vmul.f32 1.442695, %v510_v4  ;;  %v522_v12 = vmul.f32 1.442695, %v511_v61 }
 0x3d2   :  { %v498_v14 = vpop.xlane.xlu0 %497  ;;  %v501_v23 = vpop.xlane.xlu1 %500 }
 0x3d3   :  { %2565 = vpow2.f32 %v520_v6  ;;  %v512_v25 = vsub.f32 %v465_v42, %v498_v14  ;;  %v513_v28 = vsub.f32 %v470_v31, %v501_v23 }
 0x3d4   :  { %2567 = vpow2.f32 %v522_v12 }
 0x3d5   :  { %v524_v32 = vmul.f32 1.442695, %v512_v25  ;;  %v526_v1 = vmul.f32 1.442695, %v513_v28 }
 0x3d6   :  { %v504_v33 = vpop.xlane.xlu0 %503  ;;  %v507_v34 = vpop.xlane.xlu1 %506 }
 0x3d7   :  { %2569 = vpow2.f32 %v524_v32  ;;  %v514_v11 = vsub.f32 %v475_v43, %v504_v33  ;;  %v515_v30 = vsub.f32 %v480_v37, %v507_v34 }
 0x3d8   :  { %2571 = vpow2.f32 %v526_v1 }
 0x3d9   :  { %v528_v38 = vmul.f32 1.442695, %v514_v11  ;;  %v530_v40 = vmul.f32 1.442695, %v515_v30 }
 0x3da   :  { %v2562_v27 = vpop.eup %2561 }
 0x3db   :  { %2573 = vpow2.f32 %v528_v38  ;;  %v535_v20 = vsel %vm483_vm5, %v2562_v27, 0.0 }
 0x3dc   :  { %v2564_v41 = vpop.eup %2563  ;;  %2575 = vpow2.f32 %v530_v40  ;;  %536 = vadd.xlane.f32.xlu1 %v535_v20 }
 0x3dd   :  { %v532_v31 = vsel %vm483_vm5, %v2564_v41, 0.0 }
 0x3de   :  { %533 = vadd.xlane.f32.xlu0 %v532_v31 }
 0x3e0   :  { %v2566_v42 = vpop.eup %2565 }
 0x3e1   :  { %v2568_v46 = vpop.eup %2567  ;;  %v538_v49 = vsel %vm483_vm5, %v2566_v42, 0.0 }
 0x3e2   :  { %539 = vadd.xlane.f32.xlu0 %v538_v49  ;;  %v541_v37 = vsel %vm483_vm5, %v2568_v46, 0.0 }
 0x3e3   :  { %542 = vadd.xlane.f32.xlu1 %v541_v37 }
 0x3e4   :  { %v2570_v43 = vpop.eup %2569 }
 0x3e5   :  { %v2572_v51 = vpop.eup %2571  ;;  %v544_v53 = vsel %vm483_vm5, %v2570_v43, 0.0 }
 0x3e6   :  { %545 = vadd.xlane.f32.xlu0 %v544_v53  ;;  %v547_v55 = vsel %vm483_vm5, %v2572_v51, 0.0 }
 0x3e7   :  { %548 = vadd.xlane.f32.xlu1 %v547_v55 }
 0x3e8   :  { %v2574_v56 = vpop.eup %2573 }
 0x3e9   :  { %v2576_v57 = vpop.eup %2575  ;;  %v550_v59 = vsel %vm483_vm5, %v2574_v56, 0.0 }
 0x3ea   :  { %551 = vadd.xlane.f32.xlu0 %v550_v59  ;;  %v553_v60 = vsel %vm483_vm5, %v2576_v57, 0.0 }
 0x3eb   :  { %554 = vadd.xlane.f32.xlu1 %v553_v60 }
 0x3fc   :  { %572 = vrot.lane.b32.xlu1 %v2804_v50, %s2658_s24 }
 0x400   :  { %574 = vrot.lane.b32.xlu0 %v2799_v47, %s2658_s24 }
 0x465   :  { %v537_v62 = vpop.xlane.xlu1 %536 }
 0x467   :  { %v534_v4 = vpop.xlane.xlu0 %533 }
 0x468   :  { %2577 = vrcp.f32 %v534_v4 }
 0x469   :  { %2579 = vrcp.f32 %v537_v62 }
 0x46b   :  { %v540_v61 = vpop.xlane.xlu0 %539 }
 0x46c   :  { %2581 = vrcp.f32 %v540_v61  ;;  %v543_v6 = vpop.xlane.xlu1 %542 }
 0x46d   :  { %2583 = vrcp.f32 %v543_v6 }
 0x46f   :  { %v546_v12 = vpop.xlane.xlu0 %545 }
 0x470   :  { %2585 = vrcp.f32 %v546_v12  ;;  %v549_v14 = vpop.xlane.xlu1 %548 }
 0x471   :  { %2587 = vrcp.f32 %v549_v14 }
 0x473   :  { %v552_v23 = vpop.xlane.xlu0 %551 }
 0x474   :  { %2589 = vrcp.f32 %v552_v23  ;;  %v555_v25 = vpop.xlane.xlu1 %554 }
 0x475   :  { %v2578_v28 = vpop.eup %2577  ;;  %2591 = vrcp.f32 %v555_v25 }
 0x476   :  { %v564_v50 = vmul.f32 %v2578_v28, %v2564_v41  ;;  %v2580_v32 = vpop.eup %2579 }
 0x477   :  { %v575_v47 = vpop.permute.xlu0 %574  ;;  %v565_v34 = vmul.f32 %v2580_v32, %v2562_v27 }
 0x478   :  { %2361 = vmatprep.subr.mxu0 %v575_v47  ;;  %2365 = vmatprep.mubr.msk.f32.mxu0 %vm483_vm5, %v564_v50  ;;  %v573_v33 = vpop.permute.xlu1 %572 }
 0x479   :  { %v2582_v1 = vpop.eup %2581  ;;  %2362 = vmatpush3.msra.mxu0 %v575_v47 }
 0x47a   :  { %2363 = vmatprep.subr.mxu0 %v573_v33  ;;  %v566_v11 = vmul.f32 %v2582_v1, %v2566_v42  ;;  %v2584_v30 = vpop.eup %2583  ;;  %v181_v42 = vld [vmem:[%s3390_s6 + $0x18] sm:$0xff] }
 0x47b   :  { %2364 = vmatpush3.msra.mxu0 %v573_v33  ;;  %v567_v40 = vmul.f32 %v2584_v30, %v2568_v46  ;;  %2377 = vmatprep.subr.mxu1 %v181_v42  ;;  %v180_v46 = vld [vmem:[%s3390_s6 + $0x10] sm:$0xff] }
 0x47c   :  { %2366 = vmatmul.mubr.msk.f32.vlgmr.msra.gmra.mxu0 %vm483_vm5, %v565_v34  ;;  %2378 = vmatpush3.msra.mxu1 %v181_v42 }
 0x47d   :  { %v2586_v38 = vpop.eup %2585  ;;  %2368 = vmatprep.mubr.msk.f32.mxu0 %vm483_vm5, %v566_v11  ;;  %2379 = vmatprep.subr.mxu1 %v180_v46 }
 0x47e   :  { %v568_v20 = vmul.f32 %v2586_v38, %v2570_v43  ;;  %v2588_v41 = vpop.eup %2587  ;;  %2380 = vmatpush3.msra.mxu1 %v180_v46  ;;  %v179_v43 = vld [vmem:[%s3390_s6 + $0x8] sm:$0xff]  ;;  %v2131_v38 = vld [vmem:[%s3391_s7] ss:$0 sm:$0xff] }
 0x47f   :  { %v569_v49 = vmul.f32 %v2588_v41, %v2572_v51  ;;  %2381 = vmatprep.subr.mxu1 %v179_v43  ;;  %v178_v51 = vld [vmem:[%s3390_s6] sm:$0xff] }
 0x480   :  { %2369 = vmatmul.mubr.msk.f32.gmra.mxu0 %vm483_vm5, %v567_v40  ;;  %2382 = vmatpush3.msra.mxu1 %v179_v43 }
 0x481   :  { %v2590_v31 = vpop.eup %2589  ;;  %2371 = vmatprep.mubr.msk.f32.mxu0 %vm483_vm5, %v568_v20  ;;  %2383 = vmatprep.subr.mxu1 %v178_v51 }
 0x482   :  { %v570_v37 = vmul.f32 %v2590_v31, %v2574_v56  ;;  %v2592_v53 = vpop.eup %2591  ;;  %2384 = vmatpush3.msra.mxu1 %v178_v51 }
 0x483   :  { %v571_v27 = vmul.f32 %v2592_v53, %v2576_v57 }
 0x484   :  { %2372 = vmatmul.mubr.msk.f32.gmra.mxu0 %vm483_vm5, %v569_v49 }
 0x485   :  { %2374 = vmatprep.mubr.msk.f32.mxu0 %vm483_vm5, %v570_v37 }
 0x488   :  { %2375 = vmatmul.mubr.msk.f32.gmra.mxu0 %vm483_vm5, %v571_v27 }
 0x53c   :  { %v2367_v55 = vpop.f32.mrf.mxu0 }
 0x53d   :  { %v708_v14 = vmul.f32 %v2367_v55, %v2838_v63 }
 0x53e   :  { %v668_v56 = vpop.f32.mrf.mxu0 }
 0x53f   :  { %v707_v6 = vmul.f32 %v2797_v45, %v668_v56 }
 0x540   :  { %v2370_v57 = vpop.f32.mrf.mxu0 }
 0x541   :  { %v710_v4 = vmul.f32 %v2370_v57, %v2860_v9 }
 0x542   :  { %v678_v59 = vpop.f32.mrf.mxu0 }
 0x543   :  { %v709_v62 = vmul.f32 %v2842_v0, %v678_v59  ;;  %v716_v50 = vadd.f32 %v710_v4, %v708_v14  ;;  %v184_v4 = vld [vmem:[%s3392_s8 + $0x8] sm:$0xff] }
 0x544   :  { %v2373_v60 = vpop.f32.mrf.mxu0 }
 0x545   :  { %v712_v23 = vmul.f32 %v2373_v60, %v2880_v16  ;;  %v715_v28 = vadd.f32 %v709_v62, %v707_v6  ;;  %v186_v60 = vld [vmem:[%s3392_s8 + $0x18] sm:$0xff]  ;;  %v185_v62 = vld [vmem:[%s3392_s8 + $0x10] sm:$0xff] }
 0x546   :  { %v688_v61 = vpop.f32.mrf.mxu0  ;;  %2388 = vmatprep.subr.mxu0 %v186_v60 }
 0x547   :  { %v711_v12 = vmul.f32 %v2863_v10, %v688_v61  ;;  %v718_v34 = vadd.f32 %v716_v50, %v712_v23  ;;  %2389 = vmatpush3.msra.mxu0 %v186_v60  ;;  %v183_v61 = vld [vmem:[%s3392_s8] sm:$0xff] }
 0x548   :  { %v2376_v25 = vpop.f32.mrf.mxu0  ;;  %2390 = vmatprep.subr.mxu0 %v185_v62  ;;  %v188_v60 = vld [vmem:[%s3393_s10] sm:$0xff] }
 0x549   :  { %v714_v32 = vmul.f32 %v2376_v25, %v2899_v22  ;;  %v717_v1 = vadd.f32 %v715_v28, %v711_v12  ;;  %2391 = vmatpush3.msra.mxu0 %v185_v62  ;;  %v2134_v62 = vld [vmem:[%s3394_s9] ss:$0 sm:$0xff] }
 0x54a   :  { %v698_v47 = vpop.f32.mrf.mxu0  ;;  %2392 = vmatprep.subr.mxu0 %v184_v4 }
 0x54b   :  { %v713_v33 = vmul.f32 %v2884_v17, %v698_v47  ;;  %v720_v30 = vadd.f32 %v718_v34, %v714_v32  ;;  %2393 = vmatpush3.msra.mxu0 %v184_v4  ;;  %v2132_v32 = vld [vmem:[%s3388_s12 + $0x2] ss:$0 sm:$0xff] }
 0x54c   :  { %2394 = vmatprep.subr.mxu0 %v183_v61 }
 0x54d   :  { %v719_v11 = vadd.f32 %v717_v1, %v713_v33  ;;  %2395 = vmatpush3.msra.mxu0 %v183_v61 }
 0x54f   :  { %2385 = vmatprep.mubr.msk.f32.mxu1 %vm209_vm0, %v719_v11  ;;  %v2133_v11 = vld [vmem:[%s3388_s12 + $0x3] ss:$0 sm:$0xff] }
 0x550   :  { %2386 = vmatmul.mubr.msk.f32.vlgmr.msra.gmra.mxu1 %vm209_vm0, %v720_v30 }
 0x610   :  { %v2387_v40 = vpop.f32.mrf.mxu1 }
 0x611   :  { %v803_v20 = vadd.f32 %v2387_v40, %v2754_v5 }
 0x612   :  { %v793_v41 = vpop.f32.mrf.mxu1 }
 0x613   :  { %v3022_v31 = vadd.f32 %v2131_v38, %v803_v20  ;;  %v802_v49 = vadd.f32 %v793_v41, %v2749_v3  ;;  %v203_v20 = vld [vmem:[%s3393_s10 + $0x78] sm:$0xff]  ;;  %v202_v41 = vld [vmem:[%s3393_s10 + $0x70] sm:$0xff] }
 0x614   :  { %2399 = vmatprep.subr.mxu1 %v203_v20 }
 0x615   :  { %v3025_v37 = vadd.f32 %v2131_v38, %v802_v49  ;;  %v815_v53 = vsel %vm209_vm0, %v3022_v31, 0.0  ;;  %2400 = vmatpush3.msra.mxu1 %v203_v20  ;;  %v201_v49 = vld [vmem:[%s3393_s10 + $0x68] sm:$0xff] }
 0x616   :  { %816 = vadd.xlane.f32.xlu0 %v815_v53  ;;  %2401 = vmatprep.subr.mxu1 %v202_v41  ;;  %v200_v53 = vld [vmem:[%s3393_s10 + $0x60] sm:$0xff] }
 0x617   :  { %v812_v27 = vsel %vm209_vm0, %v3025_v37, 0.0  ;;  %2402 = vmatpush3.msra.mxu1 %v202_v41  ;;  %v2139_v41 = vld [vmem:[%s3395_s11] ss:$0 sm:$0xff] }
 0x618   :  { %813 = vadd.xlane.f32.xlu1 %v812_v27  ;;  %2403 = vmatprep.subr.mxu1 %v201_v49  ;;  %v199_v27 = vld [vmem:[%s3393_s10 + $0x58] sm:$0xff] }
 0x619   :  { %2404 = vmatpush3.msra.mxu1 %v201_v49 }
 0x61a   :  { %2405 = vmatprep.subr.mxu1 %v200_v53 }
 0x61b   :  { %2406 = vmatpush3.msra.mxu1 %v200_v53 }
 0x61c   :  { %2407 = vmatprep.subr.mxu1 %v199_v27 }
 0x61d   :  { %2408 = vmatpush3.msra.mxu1 %v199_v27 }
 0x69f   :  { %v817_v42 = vpop.xlane.xlu0 %816 }
 0x6a0   :  { %v819_v46 = vmul.f32 0.03125, %v817_v42  ;;  %v198_v42 = vld [vmem:[%s3393_s10 + $0x50] sm:$0xff] }
 0x6a1   :  { %v814_v43 = vpop.xlane.xlu1 %813  ;;  %2409 = vmatprep.subr.mxu1 %v198_v42 }
 0x6a2   :  { %v821_v5 = vsub.f32 %v3022_v31, %v819_v46  ;;  %v818_v51 = vmul.f32 0.03125, %v814_v43  ;;  %2410 = vmatpush3.msra.mxu1 %v198_v42  ;;  %v197_v46 = vld [vmem:[%s3393_s10 + $0x48] sm:$0xff]  ;;  %v196_v43 = vld [vmem:[%s3393_s10 + $0x40] sm:$0xff] }
 0x6a3   :  { %2411 = vmatprep.subr.mxu1 %v197_v46 }
 0x6a4   :  { %v820_v55 = vsub.f32 %v3025_v37, %v818_v51  ;;  %v823_v56 = vmul.f32 %v821_v5, %v821_v5  ;;  %2412 = vmatpush3.msra.mxu1 %v197_v46  ;;  %v194_v51 = vld [vmem:[%s3393_s10 + $0x30] sm:$0xff]  ;;  %v1038_v46 = vld [vmem:[%s3396_s2] sm:$0xff] }
 0x6a5   :  { %2413 = vmatprep.subr.mxu1 %v196_v43 }
 0x6a6   :  { %v827_v3 = vsel %vm209_vm0, %v823_v56, 0.0  ;;  %v822_v57 = vmul.f32 %v820_v55, %v820_v55  ;;  %2414 = vmatpush3.msra.mxu1 %v196_v43  ;;  %v192_v56 = vld [vmem:[%s3393_s10 + $0x20] sm:$0xff] }
 0x6a7   :  { %828 = vadd.xlane.f32.xlu1 %v827_v3  ;;  %v191_v3 = vld [vmem:[%s3393_s10 + $0x18] sm:$0xff] }
 0x6a8   :  { %v824_v59 = vsel %vm209_vm0, %v822_v57, 0.0  ;;  %v190_v57 = vld [vmem:[%s3393_s10 + $0x10] sm:$0xff] }
 0x6a9   :  { %825 = vadd.xlane.f32.xlu0 %v824_v59  ;;  %v189_v59 = vld [vmem:[%s3393_s10 + $0x8] sm:$0xff] }
 0x730   :  { %v829_v6 = vpop.xlane.xlu1 %828 }
 0x731   :  { %v831_v12 = vmul.f32 0.03125, %v829_v6 }
 0x732   :  { %v826_v14 = vpop.xlane.xlu0 %825 }
 0x733   :  { %v833_v23 = vadd.f32 1e-05, %v831_v12  ;;  %v830_v25 = vmul.f32 0.03125, %v826_v14 }
 0x735   :  { %2593 = vrsqrt.f32 %v833_v23  ;;  %v832_v28 = vadd.f32 1e-05, %v830_v25 }
 0x737   :  { %2595 = vrsqrt.f32 %v832_v28 }
 0x742   :  { %v2594_v50 = vpop.eup %2593 }
 0x743   :  { %v837_v47 = vmul.f32 %v2594_v50, %v821_v5  ;;  %v195_v5 = vld [vmem:[%s3393_s10 + $0x38] sm:$0xff] }
 0x744   :  { %v2596_v1 = vpop.eup %2595  ;;  %2415 = vmatprep.subr.mxu1 %v195_v5 }
 0x745   :  { %v836_v33 = vmul.f32 %v2596_v1, %v820_v55  ;;  %v843_v34 = vmul.f32 %v2132_v32, %v837_v47  ;;  %2416 = vmatpush3.msra.mxu1 %v195_v5  ;;  %v193_v55 = vld [vmem:[%s3393_s10 + $0x28] sm:$0xff] }
 0x746   :  { %2417 = vmatprep.subr.mxu1 %v194_v51 }
 0x747   :  { %v842_v30 = vmul.f32 %v2132_v32, %v836_v33  ;;  %v849_v40 = vadd.f32 %v2133_v11, %v843_v34  ;;  %2418 = vmatpush3.msra.mxu1 %v194_v51 }
 0x748   :  { %2419 = vmatprep.subr.mxu1 %v193_v55 }
 0x749   :  { %v848_v38 = vadd.f32 %v2133_v11, %v842_v30  ;;  %2420 = vmatpush3.msra.mxu1 %v193_v55 }
 0x74a   :  { %2421 = vmatprep.subr.mxu1 %v192_v56 }
 0x74b   :  { %2396 = vmatprep.mubr.msk.f32.mxu0 %vm209_vm0, %v848_v38  ;;  %2422 = vmatpush3.msra.mxu1 %v192_v56  ;;  %v160_v38 = vand.u32 7, %v2814_v52 }
 0x74c   :  { %2397 = vmatmul.mubr.msk.f32.vlgmr.msra.gmra.mxu0 %vm209_vm0, %v849_v40  ;;  %2423 = vmatprep.subr.mxu1 %v191_v3  ;;  %v159_v40 = vand.u32 7, %v2784_v39  ;;  %v1039_v39 = vld [vmem:[%s3396_s2 + $0x8] sm:$0xff] }
 0x74d   :  { %2424 = vmatpush3.msra.mxu1 %v191_v3  ;;  %vm3108_vm4 = vcmp.ge.s32.totalorder %v160_v38, 1  ;;  %vm164_vm6 = vcmp.lt.s32.totalorder %v160_v38, 3 }
 0x74e   :  { %2425 = vmatprep.subr.mxu1 %v190_v57  ;;  %vm161_vm7 = vcmp.ge.s32.totalorder %v159_v40, 1  ;;  %vm163_vm8 = vcmp.lt.s32.totalorder %v159_v40, 3  ;;  %vm166_vm9 = vmand %vm3108_vm4, %vm164_vm6 }
 0x74f   :  { %2426 = vmatpush3.msra.mxu1 %v190_v57  ;;  %vm165_vm10 = vmand %vm161_vm7, %vm163_vm8 }
 0x750   :  { %2427 = vmatprep.subr.mxu1 %v189_v59 }
 0x751   :  { %2428 = vmatpush3.msra.mxu1 %v189_v59 }
 0x752   :  { %2429 = vmatprep.subr.mxu1 %v188_v60 }
 0x753   :  { %2430 = vmatpush3.msra.mxu1 %v188_v60 }
 0x80c   :  { %v2398_v4 = vpop.f32.mrf.mxu0 }
 0x80d   :  { %v934_v61 = vadd.f32 %v2398_v4, %v2134_v62 }
 0x80e   :  { %v928_v6 = vpop.f32.mrf.mxu0 }
 0x80f   :  { %v2138_v12 = vmul.f32 -1.702, %v934_v61  ;;  %v929_v14 = vadd.f32 %v2134_v62, %v928_v6 }
 0x811   :  { %v943_v23 = vmul.f32 1.442695, %v2138_v12  ;;  %v2137_v25 = vmul.f32 -1.702, %v929_v14  ;;  %v2143_v12 = vld [vmem:[%s3387_s4 + $0x38] sm:$0xff] }
 0x812   :  { %2434 = vmatprep.subr.mxu0 %v2143_v12 }
 0x813   :  { %2597 = vpow2.f32 %v943_v23  ;;  %v941_v28 = vmul.f32 1.442695, %v2137_v25  ;;  %2435 = vmatpush3.msra.mxu0 %v2143_v12  ;;  %v2141_v23 = vld [vmem:[%s3387_s4 + $0x28] sm:$0xff]  ;;  %v2140_v25 = vld [vmem:[%s3387_s4 + $0x20] sm:$0xff] }
 0x815   :  { %2599 = vpow2.f32 %v941_v28 }
 0x820   :  { %v2598_v50 = vpop.eup %2597 }
 0x821   :  { %v946_v32 = vadd.f32 1.0, %v2598_v50 }
 0x822   :  { %v2600_v47 = vpop.eup %2599 }
 0x823   :  { %v945_v1 = vadd.f32 1.0, %v2600_v47  ;;  %2601 = vrcp.f32 %v946_v32 }
 0x825   :  { %2603 = vrcp.f32 %v945_v1 }
 0x830   :  { %v2602_v33 = vpop.eup %2601 }
 0x831   :  { %v952_v30 = vmul.f32 %v2602_v33, %v934_v61 }
 0x832   :  { %v2604_v34 = vpop.eup %2603 }
 0x833   :  { %v951_v11 = vmul.f32 %v2604_v34, %v929_v14  ;;  %v2142_v14 = vld [vmem:[%s3387_s4 + $0x30] sm:$0xff] }
 0x834   :  { %2436 = vmatprep.subr.mxu0 %v2142_v14 }
 0x835   :  { %2431 = vmatprep.mubr.f32.mxu1 %v951_v11  ;;  %2437 = vmatpush3.msra.mxu0 %v2142_v14  ;;  %v2176_v11 = vld [vmem:[%s3388_s12 + $0x4] ss:$0 sm:$0xff] }
 0x836   :  { %2432 = vmatmul.mubr.f32.vlgmr.msra.gmra.mxu1 %v952_v30  ;;  %2438 = vmatprep.subr.mxu0 %v2141_v23 }
 0x837   :  { %2439 = vmatpush3.msra.mxu0 %v2141_v23 }
 0x838   :  { %2440 = vmatprep.subr.mxu0 %v2140_v25 }
 0x839   :  { %2441 = vmatpush3.msra.mxu0 %v2140_v25 }
 0x8f6   :  { %v2433_v49 = vpop.f32.mrf.mxu1 }
 0x8f7   :  { %v1029_v53 = vadd.f32 %v2433_v49, %v3022_v31 }
 0x8f8   :  { %v1019_v27 = vpop.f32.mrf.mxu1 }
 0x8f9   :  { %v1037_v52 = vadd.f32 %v2139_v41, %v1029_v53  ;;  %v1028_v42 = vadd.f32 %v1019_v27, %v3025_v37 }
 0x8fb   :  { %v1036_v43 = vadd.f32 %v2139_v41, %v1028_v42  ;;  %v3125_v31 = vsel %vm166_vm9, %v1039_v39, %v1037_v52  ;;  %v2177_v41 = vld [vmem:[%s3388_s12 + $0x5] ss:$0 sm:$0xff]  ;;  %v2178_v39 = vld [vmem:[%s3389_s5 + $0x1] ss:$0 sm:$0xff] }
 0x8fc   :  { %v1094_v5 = vsel %vm209_vm0, %v3125_v31, 0.0 }
 0x8fd   :  { %1095 = vadd.xlane.f32.xlu1 %v1094_v5  ;;  %v3129_v51 = vsel %vm165_vm10, %v1038_v46, %v1036_v43 }
 0x8fe   :  { %v1091_v55 = vsel %vm209_vm0, %v3129_v51, 0.0 }
 0x8ff   :  { %1092 = vadd.xlane.f32.xlu0 %v1091_v55 }
 0x986   :  { %v1096_v56 = vpop.xlane.xlu1 %1095 }
 0x987   :  { %v1098_v37 = vmul.f32 0.03125, %v1096_v56 }
 0x988   :  { %v1093_v3 = vpop.xlane.xlu0 %1092 }
 0x989   :  { %v1100_v57 = vsub.f32 %v3125_v31, %v1098_v37  ;;  %v1097_v59 = vmul.f32 0.03125, %v1093_v3 }
 0x98b   :  { %v1099_v60 = vsub.f32 %v3129_v51, %v1097_v59  ;;  %v1102_v62 = vmul.f32 %v1100_v57, %v1100_v57 }
 0x98d   :  { %v1106_v4 = vsel %vm209_vm0, %v1102_v62, 0.0  ;;  %v1101_v61 = vmul.f32 %v1099_v60, %v1099_v60 }
 0x98e   :  { %1107 = vadd.xlane.f32.xlu1 %v1106_v4 }
 0x98f   :  { %v1103_v6 = vsel %vm209_vm0, %v1101_v61, 0.0 }
 0x990   :  { %1104 = vadd.xlane.f32.xlu0 %v1103_v6 }
 0xa17   :  { %v1108_v28 = vpop.xlane.xlu1 %1107 }
 0xa18   :  { %v1110_v50 = vmul.f32 0.03125, %v1108_v28 }
 0xa19   :  { %v1105_v32 = vpop.xlane.xlu0 %1104 }
 0xa1a   :  { %v1112_v47 = vadd.f32 1e-05, %v1110_v50  ;;  %v1109_v1 = vmul.f32 0.03125, %v1105_v32 }
 0xa1c   :  { %2605 = vrsqrt.f32 %v1112_v47  ;;  %v1111_v33 = vadd.f32 1e-05, %v1109_v1 }
 0xa1e   :  { %2607 = vrsqrt.f32 %v1111_v33 }
 0xa29   :  { %v2606_v34 = vpop.eup %2605 }
 0xa2a   :  { %v1116_v30 = vmul.f32 %v2606_v34, %v1100_v57 }
 0xa2b   :  { %v2608_v38 = vpop.eup %2607 }
 0xa2c   :  { %v1115_v40 = vmul.f32 %v2608_v38, %v1099_v60  ;;  %v1122_v20 = vmul.f32 %v2176_v11, %v1116_v30 }
 0xa2e   :  { %v1121_v49 = vmul.f32 %v2176_v11, %v1115_v40  ;;  %v1128_v27 = vadd.f32 %v2177_v41, %v1122_v20 }
 0xa30   :  { %v1127_v53 = vadd.f32 %v2177_v41, %v1121_v49 }
 0xa32   :  { %2442 = vmatprep.mubr.msk.f32.mxu0 %vm209_vm0, %v1127_v53 }
 0xa33   :  { %2443 = vmatmul.mubr.msk.f32.vlgmr.msra.gmra.mxu0 %vm209_vm0, %v1128_v27 }
 0xaf3   :  { %v2444_v52 = vpop.f32.mrf.mxu0 }
 0xaf4   :  { %v3160_v42 = vadd.f32 %v2444_v52, %v2178_v39 }
 0xaf5   :  { %v1207_v46 = vpop.f32.mrf.mxu0 }
 0xaf6   :  { %v3162_v43 = vadd.f32 %v2178_v39, %v1207_v46  ;;  %1228 = vrot.lane.b32.xlu0 %v3160_v42, %s2656_s23  ;;  %v1217_v37 = vmul.f32 %v3160_v42, %v2854_v7  ;;  %v1221_v7 = vmul.f32 %v3160_v42, %v2891_v19 }
 0xaf8   :  { %1226 = vrot.lane.b32.xlu1 %v3162_v43, %s2656_s23  ;;  %v1216_v5 = vmul.f32 %v3162_v43, %v2802_v48  ;;  %v1218_v3 = vmul.f32 %v3162_v43, %v2857_v8  ;;  %v1219_v48 = vmul.f32 %v3160_v42, %v2872_v13  ;;  %v1220_v57 = vmul.f32 %v3162_v43, %v2877_v15 }
 0xaf9   :  { %v1222_v8 = vmul.f32 %v3162_v43, %v2896_v21  ;;  %v1223_v13 = vmul.f32 %v3160_v42, %v2906_v24 }
 0xafa   :  { %2449 = vmatprep.mubr.msk.f32.mxu0 %vm209_vm0, %v1216_v5 }
 0xb68   :  { %v1229_v55 = vpop.permute.xlu0 %1228 }
 0xb69   :  { %2445 = vmatprep.subr.msk.mxu0 %vm209_vm0, %v1229_v55 }
 0xb6a   :  { %2446 = vmatpush3.xpose.msk.msra.mxu0 %vm209_vm0, %v1229_v55  ;;  %v1227_v56 = vpop.permute.xlu1 %1226 }
 0xb6b   :  { %2447 = vmatprep.subr.msk.mxu0 %vm209_vm0, %v1227_v56 }
 0xb6e   :  { %2448 = vmatpush3.xpose.msk.msra.mxu0 %vm209_vm0, %v1227_v56 }
 0xb71   :  { %2450 = vmatmul.mubr.msk.f32.vlgmr.msra.gmra.mxu0 %vm209_vm0, %v1217_v37 }
 0xb72   :  { %2452 = vmatprep.mubr.msk.f32.mxu0 %vm209_vm0, %v1218_v3 }
 0xb75   :  { %2453 = vmatmul.mubr.msk.f32.gmra.mxu0 %vm209_vm0, %v1219_v48 }
 0xb76   :  { %2455 = vmatprep.mubr.msk.f32.mxu0 %vm209_vm0, %v1220_v57 }
 0xb79   :  { %2456 = vmatmul.mubr.msk.f32.gmra.mxu0 %vm209_vm0, %v1221_v7 }
 0xb7a   :  { %2458 = vmatprep.mubr.msk.f32.mxu0 %vm209_vm0, %v1222_v8 }
 0xb7d   :  { %2459 = vmatmul.mubr.msk.f32.gmra.mxu0 %vm209_vm0, %v1223_v13 }
 0xc31   :  { %v2451_v15 = vpop.f32.mrf.mxu0 }
 0xc32   :  { %v1330_v59 = vadd.f32 %v2451_v15, %v2931_v54 }
 0xc33   :  { %v1324_v60 = vpop.f32.mrf.mxu0 }
 0xc34   :  { %v1325_v62 = vadd.f32 %v1324_v60, %v2936_v58  ;;  %v1366_v19 = vsel %vm483_vm5, %v1330_v59, -inf }
 0xc35   :  { %1367 = vmax.xlane.f32.xlu0 %v1366_v19  ;;  %v2454_v4 = vpop.f32.mrf.mxu0 }
 0xc36   :  { %v1340_v21 = vadd.f32 %v2454_v4, %v2941_v2  ;;  %v1363_v61 = vsel %vm483_vm5, %v1325_v62, -inf }
 0xc37   :  { %v1334_v6 = vpop.f32.mrf.mxu0  ;;  %1364 = vmax.xlane.f32.xlu1 %v1363_v61 }
 0xc38   :  { %v1335_v24 = vadd.f32 %v1334_v6, %v2949_v18  ;;  %v1372_v23 = vsel %vm483_vm5, %v1340_v21, -inf }
 0xc39   :  { %v2457_v12 = vpop.f32.mrf.mxu0 }
 0xc3a   :  { %v1350_v14 = vadd.f32 %v2457_v12, %v2955_v26  ;;  %v1369_v54 = vsel %vm483_vm5, %v1335_v24, -inf }
 0xc3b   :  { %v1344_v58 = vpop.f32.mrf.mxu0  ;;  %1370 = vmax.xlane.f32.xlu0 %v1369_v54  ;;  %1373 = vmax.xlane.f32.xlu1 %v1372_v23 }
 0xc3c   :  { %v1345_v25 = vadd.f32 %v1344_v58, %v2960_v29  ;;  %v1378_v32 = vsel %vm483_vm5, %v1350_v14, -inf }
 0xc3d   :  { %v2460_v28 = vpop.f32.mrf.mxu0 }
 0xc3e   :  { %v1360_v2 = vadd.f32 %v2460_v28, %v2965_v35  ;;  %v1375_v50 = vsel %vm483_vm5, %v1345_v25, -inf }
 0xc3f   :  { %v1354_v18 = vpop.f32.mrf.mxu0  ;;  %1376 = vmax.xlane.f32.xlu0 %v1375_v50  ;;  %1379 = vmax.xlane.f32.xlu1 %v1378_v32 }
 0xc40   :  { %v1355_v26 = vadd.f32 %v1354_v18, %v2968_v36  ;;  %v1384_v1 = vsel %vm483_vm5, %v1360_v2, -inf }
 0xc42   :  { %v1381_v47 = vsel %vm483_vm5, %v1355_v26, -inf }
 0xc43   :  { %1382 = vmax.xlane.f32.xlu0 %v1381_v47  ;;  %1385 = vmax.xlane.f32.xlu1 %v1384_v1 }
 0xcbe   :  { %v1368_v33 = vpop.xlane.xlu0 %1367 }
 0xcbf   :  { %v1388_v29 = vsub.f32 %v1330_v59, %v1368_v33 }
 0xcc0   :  { %v1365_v34 = vpop.xlane.xlu1 %1364 }
 0xcc1   :  { %v1397_v11 = vmul.f32 1.442695, %v1388_v29  ;;  %v1387_v35 = vsub.f32 %v1325_v62, %v1365_v34 }
 0xcc3   :  { %2609 = vpow2.f32 %v1397_v11  ;;  %v1395_v30 = vmul.f32 1.442695, %v1387_v35 }
 0xcc4   :  { %v1371_v38 = vpop.xlane.xlu0 %1370  ;;  %v1374_v40 = vpop.xlane.xlu1 %1373 }
 0xcc5   :  { %2611 = vpow2.f32 %v1395_v30  ;;  %v1389_v20 = vsub.f32 %v1335_v24, %v1371_v38  ;;  %v1390_v41 = vsub.f32 %v1340_v21, %v1374_v40 }
 0xcc7   :  { %v1399_v49 = vmul.f32 1.442695, %v1389_v20  ;;  %v1401_v36 = vmul.f32 1.442695, %v1390_v41 }
 0xcc8   :  { %v1377_v53 = vpop.xlane.xlu0 %1376  ;;  %v1380_v27 = vpop.xlane.xlu1 %1379 }
 0xcc9   :  { %2613 = vpow2.f32 %v1399_v49  ;;  %v1391_v39 = vsub.f32 %v1345_v25, %v1377_v53  ;;  %v1392_v52 = vsub.f32 %v1350_v14, %v1380_v27  ;;  %v2148_v27 = vld [vmem:[%s3390_s6 + $0x38] sm:$0xff] }
 0xcca   :  { %2615 = vpow2.f32 %v1401_v36  ;;  %2477 = vmatprep.subr.mxu1 %v2148_v27 }
 0xccb   :  { %v1403_v46 = vmul.f32 1.442695, %v1391_v39  ;;  %v1405_v5 = vmul.f32 1.442695, %v1392_v52  ;;  %2478 = vmatpush3.msra.mxu1 %v2148_v27  ;;  %v2147_v39 = vld [vmem:[%s3390_s6 + $0x30] sm:$0xff]  ;;  %v2146_v52 = vld [vmem:[%s3390_s6 + $0x28] sm:$0xff] }
 0xccc   :  { %v1383_v55 = vpop.xlane.xlu0 %1382  ;;  %v1386_v56 = vpop.xlane.xlu1 %1385  ;;  %2479 = vmatprep.subr.mxu1 %v2147_v39 }
 0xccd   :  { %2617 = vpow2.f32 %v1403_v46  ;;  %v1393_v37 = vsub.f32 %v1355_v26, %v1383_v55  ;;  %v1394_v3 = vsub.f32 %v1360_v2, %v1386_v56  ;;  %2480 = vmatpush3.msra.mxu1 %v2147_v39  ;;  %v2145_v46 = vld [vmem:[%s3390_s6 + $0x20] sm:$0xff] }
 0xcce   :  { %2619 = vpow2.f32 %v1405_v5  ;;  %2481 = vmatprep.subr.mxu1 %v2146_v52 }
 0xccf   :  { %v1407_v48 = vmul.f32 1.442695, %v1393_v37  ;;  %v1409_v57 = vmul.f32 1.442695, %v1394_v3  ;;  %2482 = vmatpush3.msra.mxu1 %v2146_v52  ;;  %v2170_v52 = vld [vmem:[%s3393_s10 + $0xf8] sm:$0xff] }
 0xcd0   :  { %v2610_v7 = vpop.eup %2609  ;;  %2483 = vmatprep.subr.mxu1 %v2145_v46 }
 0xcd1   :  { %2621 = vpow2.f32 %v1407_v48  ;;  %v1414_v8 = vsel %vm483_vm5, %v2610_v7, 0.0  ;;  %2484 = vmatpush3.msra.mxu1 %v2145_v46  ;;  %v2169_v46 = vld [vmem:[%s3393_s10 + $0xf0] sm:$0xff] }
 0xcd2   :  { %v2612_v13 = vpop.eup %2611  ;;  %2623 = vpow2.f32 %v1409_v57  ;;  %1415 = vadd.xlane.f32.xlu1 %v1414_v8 }
 0xcd3   :  { %v1411_v15 = vsel %vm483_vm5, %v2612_v13, 0.0 }
 0xcd4   :  { %1412 = vadd.xlane.f32.xlu0 %v1411_v15 }
 0xcd6   :  { %v2614_v59 = vpop.eup %2613 }
 0xcd7   :  { %v2616_v60 = vpop.eup %2615  ;;  %v1417_v62 = vsel %vm483_vm5, %v2614_v59, 0.0 }
 0xcd8   :  { %1418 = vadd.xlane.f32.xlu0 %v1417_v62  ;;  %v1420_v19 = vsel %vm483_vm5, %v2616_v60, 0.0 }
 0xcd9   :  { %1421 = vadd.xlane.f32.xlu1 %v1420_v19 }
 0xcda   :  { %v2618_v4 = vpop.eup %2617 }
 0xcdb   :  { %v2620_v21 = vpop.eup %2619  ;;  %v1423_v61 = vsel %vm483_vm5, %v2618_v4, 0.0 }
 0xcdc   :  { %1424 = vadd.xlane.f32.xlu0 %v1423_v61  ;;  %v1426_v6 = vsel %vm483_vm5, %v2620_v21, 0.0 }
 0xcdd   :  { %1427 = vadd.xlane.f32.xlu1 %v1426_v6 }
 0xcde   :  { %v2622_v24 = vpop.eup %2621 }
 0xcdf   :  { %v2624_v12 = vpop.eup %2623  ;;  %v1429_v14 = vsel %vm483_vm5, %v2622_v24, 0.0 }
 0xce0   :  { %1430 = vadd.xlane.f32.xlu0 %v1429_v14  ;;  %v1432_v54 = vsel %vm483_vm5, %v2624_v12, 0.0 }
 0xce1   :  { %1433 = vadd.xlane.f32.xlu1 %v1432_v54 }
 0xcf2   :  { %1451 = vrot.lane.b32.xlu1 %v3162_v43, %s2658_s24 }
 0xcf6   :  { %1453 = vrot.lane.b32.xlu0 %v3160_v42, %s2658_s24 }
 0xd5b   :  { %v1416_v23 = vpop.xlane.xlu1 %1415 }
 0xd5d   :  { %v1413_v58 = vpop.xlane.xlu0 %1412 }
 0xd5e   :  { %2625 = vrcp.f32 %v1413_v58 }
 0xd5f   :  { %2627 = vrcp.f32 %v1416_v23 }
 0xd61   :  { %v1419_v25 = vpop.xlane.xlu0 %1418 }
 0xd62   :  { %2629 = vrcp.f32 %v1419_v25  ;;  %v1422_v28 = vpop.xlane.xlu1 %1421 }
 0xd63   :  { %2631 = vrcp.f32 %v1422_v28 }
 0xd65   :  { %v1425_v2 = vpop.xlane.xlu0 %1424 }
 0xd66   :  { %2633 = vrcp.f32 %v1425_v2  ;;  %v1428_v50 = vpop.xlane.xlu1 %1427 }
 0xd67   :  { %2635 = vrcp.f32 %v1428_v50 }
 0xd69   :  { %v1431_v32 = vpop.xlane.xlu0 %1430 }
 0xd6a   :  { %2637 = vrcp.f32 %v1431_v32  ;;  %v1434_v18 = vpop.xlane.xlu1 %1433 }
 0xd6b   :  { %v2626_v26 = vpop.eup %2625  ;;  %2639 = vrcp.f32 %v1434_v18 }
 0xd6c   :  { %v1443_v43 = vmul.f32 %v2626_v26, %v2612_v13  ;;  %v2628_v47 = vpop.eup %2627  ;;  %v2153_v26 = vld [vmem:[%s3392_s8 + $0x38] sm:$0xff] }
 0xd6d   :  { %v1454_v42 = vpop.permute.xlu0 %1453  ;;  %v1444_v29 = vmul.f32 %v2628_v47, %v2610_v7  ;;  %2488 = vmatprep.subr.mxu1 %v2153_v26  ;;  %v2151_v47 = vld [vmem:[%s3392_s8 + $0x28] sm:$0xff] }
 0xd6e   :  { %2461 = vmatprep.subr.mxu0 %v1454_v42  ;;  %2465 = vmatprep.mubr.msk.f32.mxu0 %vm483_vm5, %v1443_v43  ;;  %v1452_v33 = vpop.permute.xlu1 %1451  ;;  %v2152_v43 = vld [vmem:[%s3392_s8 + $0x30] sm:$0xff] }
 0xd6f   :  { %v2630_v1 = vpop.eup %2629  ;;  %2462 = vmatpush3.msra.mxu0 %v1454_v42  ;;  %v2150_v42 = vld [vmem:[%s3392_s8 + $0x20] sm:$0xff] }
 0xd70   :  { %2463 = vmatprep.subr.mxu0 %v1452_v33  ;;  %v1445_v34 = vmul.f32 %v2630_v1, %v2614_v59  ;;  %v2632_v11 = vpop.eup %2631 }
 0xd71   :  { %2464 = vmatpush3.msra.mxu0 %v1452_v33  ;;  %v1446_v30 = vmul.f32 %v2632_v11, %v2616_v60 }
 0xd72   :  { %2466 = vmatmul.mubr.msk.f32.vlgmr.msra.gmra.mxu0 %vm483_vm5, %v1444_v29  ;;  %2499 = vmatprep.subr.mxu0 %v2170_v52 }
 0xd73   :  { %v2634_v35 = vpop.eup %2633  ;;  %2468 = vmatprep.mubr.msk.f32.mxu0 %vm483_vm5, %v1445_v34  ;;  %2500 = vmatpush3.msra.mxu0 %v2170_v52 }
 0xd74   :  { %v1447_v38 = vmul.f32 %v2634_v35, %v2618_v4  ;;  %v2636_v40 = vpop.eup %2635  ;;  %2501 = vmatprep.subr.mxu0 %v2169_v46 }
 0xd75   :  { %v1448_v41 = vmul.f32 %v2636_v40, %v2620_v21  ;;  %2502 = vmatpush3.msra.mxu0 %v2169_v46 }
 0xd76   :  { %2469 = vmatmul.mubr.msk.f32.gmra.mxu0 %vm483_vm5, %v1446_v30 }
 0xd77   :  { %v2638_v20 = vpop.eup %2637  ;;  %2471 = vmatprep.mubr.msk.f32.mxu0 %vm483_vm5, %v1447_v38  ;;  %v2202_v38 = vld [vmem:[%s3388_s12 + $0x6] ss:$0 sm:$0xff] }
 0xd78   :  { %v1449_v49 = vmul.f32 %v2638_v20, %v2622_v24  ;;  %v2640_v36 = vpop.eup %2639 }
 0xd79   :  { %v1450_v53 = vmul.f32 %v2640_v36, %v2624_v12  ;;  %v2203_v36 = vld [vmem:[%s3388_s12 + $0x7] ss:$0 sm:$0xff] }
 0xd7a   :  { %2472 = vmatmul.mubr.msk.f32.gmra.mxu0 %vm483_vm5, %v1448_v41 }
 0xd7b   :  { %2474 = vmatprep.mubr.msk.f32.mxu0 %vm483_vm5, %v1449_v49 }
 0xd7e   :  { %2475 = vmatmul.mubr.msk.f32.gmra.mxu0 %vm483_vm5, %v1450_v53 }
 0xe32   :  { %v2467_v5 = vpop.f32.mrf.mxu0 }
 0xe33   :  { %v1587_v15 = vmul.f32 %v2467_v5, %v2838_v63  ;;  %v2168_v5 = vld [vmem:[%s3393_s10 + $0xe8] sm:$0xff] }
 0xe34   :  { %v1547_v55 = vpop.f32.mrf.mxu0  ;;  %2503 = vmatprep.subr.mxu0 %v2168_v5 }
 0xe35   :  { %v1586_v8 = vmul.f32 %v2797_v45, %v1547_v55  ;;  %v2201_v45 = vld [vmem:[%s3391_s7 + $0x1] ss:$0 sm:$0xff]  ;;  %2504 = vmatpush3.msra.mxu0 %v2168_v5 }
 0xe36   :  { %v2470_v56 = vpop.f32.mrf.mxu0  ;;  %v2167_v55 = vld [vmem:[%s3393_s10 + $0xe0] sm:$0xff] }
 0xe37   :  { %v1589_v57 = vmul.f32 %v2470_v56, %v2860_v9  ;;  %2505 = vmatprep.subr.mxu0 %v2167_v55  ;;  %v2166_v56 = vld [vmem:[%s3393_s10 + $0xd8] sm:$0xff] }
 0xe38   :  { %v1557_v37 = vpop.f32.mrf.mxu0  ;;  %2506 = vmatpush3.msra.mxu0 %v2167_v55 }
 0xe39   :  { %v1588_v48 = vmul.f32 %v2842_v0, %v1557_v37  ;;  %v1595_v19 = vadd.f32 %v1589_v57, %v1587_v15  ;;  %2507 = vmatprep.subr.mxu0 %v2166_v56  ;;  %v2165_v37 = vld [vmem:[%s3393_s10 + $0xd0] sm:$0xff]  ;;  %v2162_v57 = vld [vmem:[%s3393_s10 + $0xb8] sm:$0xff] }
 0xe3a   :  { %v2473_v3 = vpop.f32.mrf.mxu0  ;;  %2508 = vmatpush3.msra.mxu0 %v2166_v56  ;;  %v2158_v15 = vld [vmem:[%s3393_s10 + $0x98] sm:$0xff] }
 0xe3b   :  { %v1591_v59 = vmul.f32 %v2473_v3, %v2880_v16  ;;  %v1594_v62 = vadd.f32 %v1588_v48, %v1586_v8  ;;  %2509 = vmatprep.subr.mxu0 %v2165_v37  ;;  %v2164_v3 = vld [vmem:[%s3393_s10 + $0xc8] sm:$0xff]  ;;  %v2163_v48 = vld [vmem:[%s3393_s10 + $0xc0] sm:$0xff] }
 0xe3c   :  { %v1567_v7 = vpop.f32.mrf.mxu0  ;;  %2510 = vmatpush3.msra.mxu0 %v2165_v37  ;;  %v2160_v8 = vld [vmem:[%s3393_s10 + $0xa8] sm:$0xff] }
 0xe3d   :  { %v1590_v13 = vmul.f32 %v2863_v10, %v1567_v7  ;;  %v1597_v6 = vadd.f32 %v1595_v19, %v1591_v59  ;;  %2511 = vmatprep.subr.mxu0 %v2164_v3  ;;  %v2161_v7 = vld [vmem:[%s3393_s10 + $0xb0] sm:$0xff]  ;;  %v2204_v19 = vld [vmem:[%s3394_s9 + $0x1] ss:$0 sm:$0xff] }
 0xe3e   :  { %v2476_v60 = vpop.f32.mrf.mxu0  ;;  %2512 = vmatpush3.msra.mxu0 %v2164_v3  ;;  %v2157_v59 = vld [vmem:[%s3393_s10 + $0x90] sm:$0xff] }
 0xe3f   :  { %v1593_v4 = vmul.f32 %v2476_v60, %v2899_v22  ;;  %v1596_v61 = vadd.f32 %v1594_v62, %v1590_v13  ;;  %2513 = vmatprep.subr.mxu0 %v2163_v48  ;;  %v2159_v13 = vld [vmem:[%s3393_s10 + $0xa0] sm:$0xff]  ;;  %v2156_v60 = vld [vmem:[%s3393_s10 + $0x88] sm:$0xff] }
 0xe40   :  { %v1577_v21 = vpop.f32.mrf.mxu0  ;;  %2514 = vmatpush3.msra.mxu0 %v2163_v48  ;;  %v2155_v62 = vld [vmem:[%s3393_s10 + $0x80] sm:$0xff] }
 0xe41   :  { %v1592_v0 = vmul.f32 %v2884_v17, %v1577_v21  ;;  %v1599_v24 = vadd.f32 %v1597_v6, %v1593_v4  ;;  %2515 = vmatprep.subr.mxu0 %v2162_v57 }
 0xe42   :  { %2516 = vmatpush3.msra.mxu0 %v2162_v57 }
 0xe43   :  { %v1598_v9 = vadd.f32 %v1596_v61, %v1592_v0  ;;  %2517 = vmatprep.subr.mxu0 %v2161_v7 }
 0xe44   :  { %2518 = vmatpush3.msra.mxu0 %v2161_v7 }
 0xe45   :  { %2485 = vmatprep.mubr.msk.f32.mxu1 %vm209_vm0, %v1598_v9  ;;  %2519 = vmatprep.subr.mxu0 %v2160_v8 }
 0xe46   :  { %2486 = vmatmul.mubr.msk.f32.vlgmr.msra.gmra.mxu1 %vm209_vm0, %v1599_v24  ;;  %2520 = vmatpush3.msra.mxu0 %v2160_v8 }
 0xe47   :  { %2489 = vmatpush3.msra.mxu1 %v2153_v26  ;;  %2521 = vmatprep.subr.mxu0 %v2159_v13 }
 0xe48   :  { %2490 = vmatprep.subr.mxu1 %v2152_v43  ;;  %2522 = vmatpush3.msra.mxu0 %v2159_v13 }
 0xe49   :  { %2491 = vmatpush3.msra.mxu1 %v2152_v43  ;;  %2523 = vmatprep.subr.mxu0 %v2158_v15 }
 0xe4a   :  { %2492 = vmatprep.subr.mxu1 %v2151_v47  ;;  %2524 = vmatpush3.msra.mxu0 %v2158_v15 }
 0xe4b   :  { %2493 = vmatpush3.msra.mxu1 %v2151_v47  ;;  %2525 = vmatprep.subr.mxu0 %v2157_v59 }
 0xe4c   :  { %2494 = vmatprep.subr.mxu1 %v2150_v42  ;;  %2526 = vmatpush3.msra.mxu0 %v2157_v59 }
 0xe4d   :  { %2495 = vmatpush3.msra.mxu1 %v2150_v42  ;;  %2527 = vmatprep.subr.mxu0 %v2156_v60 }
 0xe4e   :  { %2534 = vmatprep.subr.mxu1 %v2655_v44  ;;  %2528 = vmatpush3.msra.mxu0 %v2156_v60 }
 0xe4f   :  { %2529 = vmatprep.subr.mxu0 %v2155_v62 }
 0xe50   :  { %2530 = vmatpush3.msra.mxu0 %v2155_v62 }
 0xf06   :  { %v2487_v63 = vpop.f32.mrf.mxu1 }
 0xf07   :  { %v1682_v10 = vadd.f32 %v2487_v63, %v3125_v31 }
 0xf08   :  { %v1672_v16 = vpop.f32.mrf.mxu1 }
 0xf09   :  { %v3258_v22 = vadd.f32 %v2201_v45, %v1682_v10  ;;  %v1681_v12 = vadd.f32 %v1672_v16, %v3129_v51 }
 0xf0b   :  { %v3261_v17 = vadd.f32 %v2201_v45, %v1681_v12  ;;  %v1694_v14 = vsel %vm209_vm0, %v3258_v22, 0.0 }
 0xf0c   :  { %1695 = vadd.xlane.f32.xlu0 %v1694_v14 }
 0xf0d   :  { %v1691_v54 = vsel %vm209_vm0, %v3261_v17, 0.0 }
 0xf0e   :  { %1692 = vadd.xlane.f32.xlu1 %v1691_v54 }
 0xf95   :  { %v1696_v23 = vpop.xlane.xlu0 %1695 }
 0xf96   :  { %v1698_v58 = vmul.f32 0.03125, %v1696_v23 }
 0xf97   :  { %v1693_v25 = vpop.xlane.xlu1 %1692 }
 0xf98   :  { %v1700_v31 = vsub.f32 %v3258_v22, %v1698_v58  ;;  %v1697_v28 = vmul.f32 0.03125, %v1693_v25  ;;  %v2209_v25 = vld [vmem:[%s3395_s11 + $0x1] ss:$0 sm:$0xff] }
 0xf9a   :  { %v1699_v2 = vsub.f32 %v3261_v17, %v1697_v28  ;;  %v1702_v50 = vmul.f32 %v1700_v31, %v1700_v31 }
 0xf9c   :  { %v1706_v51 = vsel %vm209_vm0, %v1702_v50, 0.0  ;;  %v1701_v32 = vmul.f32 %v1699_v2, %v1699_v2 }
 0xf9d   :  { %1707 = vadd.xlane.f32.xlu1 %v1706_v51 }
 0xf9e   :  { %v1703_v18 = vsel %vm209_vm0, %v1701_v32, 0.0 }
 0xf9f   :  { %1704 = vadd.xlane.f32.xlu0 %v1703_v18  ;;  %v1917_v18 = vld [vmem:[%s3397_s3] sm:$0xff] }
0x1026   :  { %v1708_v1 = vpop.xlane.xlu1 %1707 }
0x1027   :  { %v1710_v33 = vmul.f32 0.03125, %v1708_v1 }
0x1028   :  { %v1705_v29 = vpop.xlane.xlu0 %1704 }
0x1029   :  { %v1712_v34 = vadd.f32 1e-05, %v1710_v33  ;;  %v1709_v11 = vmul.f32 0.03125, %v1705_v29  ;;  %v2019_v29 = vld [vmem:[%s3398_s14 + $0x18] sm:$0xff] }
0x102b   :  { %2641 = vrsqrt.f32 %v1712_v34  ;;  %v1711_v35 = vadd.f32 1e-05, %v1709_v11  ;;  %v2018_v34 = vld [vmem:[%s3398_s14 + $0x10] sm:$0xff]  ;;  %v2017_v11 = vld [vmem:[%s3398_s14 + $0x8] sm:$0xff] }
0x102d   :  { %2643 = vrsqrt.f32 %v1711_v35  ;;  %v2016_v35 = vld [vmem:[%s3398_s14] sm:$0xff] }
0x1038   :  { %v2642_v30 = vpop.eup %2641 }
0x1039   :  { %v1716_v40 = vmul.f32 %v2642_v30, %v1700_v31 }
0x103a   :  { %v2644_v20 = vpop.eup %2643 }
0x103b   :  { %v1715_v41 = vmul.f32 %v2644_v20, %v1699_v2  ;;  %v1722_v49 = vmul.f32 %v2202_v38, %v1716_v40 }
0x103d   :  { %v1721_v53 = vmul.f32 %v2202_v38, %v1715_v41  ;;  %v1728_v39 = vadd.f32 %v2203_v36, %v1722_v49  ;;  %v2211_v41 = vld [vmem:[%s3399_s13] ss:$0 sm:$0xff] }
0x103f   :  { %v1727_v27 = vadd.f32 %v2203_v36, %v1721_v53  ;;  %v2212_v36 = vld [vmem:[%s3399_s13 + $0x1] ss:$0 sm:$0xff] }
0x1041   :  { %2496 = vmatprep.mubr.msk.f32.mxu1 %vm209_vm0, %v1727_v27 }
0x1042   :  { %2497 = vmatmul.mubr.msk.f32.vlgmr.msra.gmra.mxu1 %vm209_vm0, %v1728_v39 }
0x1043   :  { %2538 = vmatprep.mubr.msk.f32.mxu1 %vm2659_vm11, %v2655_v44 }
0x1102   :  { %v2498_v4 = vpop.f32.mrf.mxu1 }
0x1103   :  { %v1813_v21 = vadd.f32 %v2498_v4, %v2204_v19 }
0x1104   :  { %v1807_v61 = vpop.f32.mrf.mxu1 }
0x1105   :  { %v2208_v0 = vmul.f32 -1.702, %v1813_v21  ;;  %v1808_v6 = vadd.f32 %v2204_v19, %v1807_v61 }
0x1107   :  { %v1822_v9 = vmul.f32 1.442695, %v2208_v0  ;;  %v2207_v24 = vmul.f32 -1.702, %v1808_v6 }
0x1109   :  { %2645 = vpow2.f32 %v1822_v9  ;;  %v1820_v45 = vmul.f32 1.442695, %v2207_v24 }
0x110b   :  { %2647 = vpow2.f32 %v1820_v45 }
0x1116   :  { %v2646_v63 = vpop.eup %2645 }
0x1117   :  { %v1825_v10 = vadd.f32 1.0, %v2646_v63 }
0x1118   :  { %v2648_v16 = vpop.eup %2647 }
0x1119   :  { %v1824_v12 = vadd.f32 1.0, %v2648_v16  ;;  %2649 = vrcp.f32 %v1825_v10 }
0x111b   :  { %2651 = vrcp.f32 %v1824_v12 }
0x1126   :  { %v2650_v14 = vpop.eup %2649 }
0x1127   :  { %v1831_v58 = vmul.f32 %v2650_v14, %v1813_v21 }
0x1128   :  { %v2652_v54 = vpop.eup %2651 }
0x1129   :  { %v1830_v23 = vmul.f32 %v2652_v54, %v1808_v6 }
0x112b   :  { %2531 = vmatprep.mubr.f32.mxu0 %v1830_v23 }
0x112c   :  { %2532 = vmatmul.mubr.f32.vlgmr.msra.gmra.mxu0 %v1831_v58 }
0x11ec   :  { %v2533_v31 = vpop.f32.mrf.mxu0 }
0x11ed   :  { %v1908_v28 = vadd.f32 %v2533_v31, %v3258_v22 }
0x11ee   :  { %v1898_v2 = vpop.f32.mrf.mxu0 }
0x11ef   :  { %v1916_v50 = vadd.f32 %v2209_v25, %v1908_v28  ;;  %v1907_v51 = vadd.f32 %v1898_v2, %v3261_v17 }
0x11f1   :  { %v1915_v32 = vadd.f32 %v2209_v25, %v1907_v51  ;;  %2535 = vmatpush3.msra.mxu1 %v1916_v50 }
0x11f2   :  { %2536 = vmatprep.subr.mxu1 %v2655_v44 }
0x11f3   :  { %2537 = vmatpush3.msra.mxu1 %v1915_v32 }
0x11f4   :  { %2539 = vmatmul.mubr.msk.f32.vlgmr.msra.gmra.mxu1 %vm483_vm5, %v1917_v18  ;;  %2541 = vmatprep.subr.mxu1 %v2655_v44 }
0x11f5   :  { %2549 = vmatprep.mubr.msk.f32.mxu1 %vm2659_vm11, %v2655_v44  ;;  %2542 = vmatpush3.msra.mxu1 %v2019_v29 }
0x11f6   :  { %2543 = vmatprep.subr.mxu1 %v2655_v44 }
0x11f7   :  { %2544 = vmatpush3.msra.mxu1 %v2018_v34 }
0x11f8   :  { %2545 = vmatprep.subr.mxu1 %v2655_v44 }
0x11f9   :  { %2546 = vmatpush3.msra.mxu1 %v2017_v11 }
0x11fa   :  { %2547 = vmatprep.subr.mxu1 %v2655_v44 }
0x11fb   :  { %2548 = vmatpush3.msra.mxu1 %v2016_v35 }
0x12b4   :  { %v1987_v22 = vpop.f32.mrf.mxu1 }
0x12b5   :  { %v1993_v26 = vsel %vm209_vm0, %v1987_v22, 0.0 }
0x12b6   :  { %1994 = vadd.xlane.f32.xlu0 %v1993_v26  ;;  %v2540_v17 = vpop.f32.mrf.mxu1 }
0x133f   :  { %v1995_v43 = vpop.xlane.xlu0 %1994 }
0x1340   :  { %v1996_v47 = vmul.f32 0.03125, %v1995_v43 }
0x1342   :  { %v1997_v42 = vsub.f32 %v1987_v22, %v1996_v47 }
0x1344   :  { %v1998_v1 = vmul.f32 %v1997_v42, %v1997_v42 }
0x1346   :  { %v1999_v33 = vsel %vm209_vm0, %v1998_v1, 0.0 }
0x1347   :  { %2000 = vadd.xlane.f32.xlu1 %v1999_v33 }
0x13d0   :  { %v2001_v30 = vpop.xlane.xlu1 %2000 }
0x13d1   :  { %v2002_v38 = vmul.f32 0.03125, %v2001_v30 }
0x13d3   :  { %v2003_v40 = vadd.f32 1e-05, %v2002_v38 }
0x13d5   :  { %2653 = vrsqrt.f32 %v2003_v40 }
0x13e2   :  { %v2654_v20 = vpop.eup %2653 }
0x13e3   :  { %v2005_v49 = vmul.f32 %v2654_v20, %v1997_v42 }
0x13e5   :  { %v2010_v53 = vmul.f32 %v2211_v41, %v2005_v49 }
0x13e7   :  { %v2015_v27 = vadd.f32 %v2212_v36, %v2010_v53 }
0x13e9   :  { %2550 = vmatmul.mubr.msk.f32.vlgmr.msra.gmra.mxu1 %vm209_vm0, %v2015_v27 }
0x14a9   :  { %v2089_v44 = vpop.f32.mrf.mxu1 }
0x14aa   :  { %2093 = vst [vmem:[%s3400_s15] sm:$0xff] %v2089_v44 }
0x14ab   :  { %v2551_v39 = vpop.f32.mrf.mxu1 }

</bundles_post_ra>
